<compile_context>
chip_gen: v6e
topology: v6e:2x2x1
jax: 0.10.0
libtpu: 0.0.40
codegen_flags: <defaults>
</compile_context>

<pallas_src>
import functools

import jax
import jax.numpy as jnp
from jax.experimental import pallas as pl
from jax.experimental.pallas import tpu as pltpu


def _round_up(x, m=128):
    return (x + m - 1) // m * m


def _vmem_capacity_bytes(default=64 * 1024 * 1024):
    """Physical per-core VMEM, generation aware (v5e/v6e: 128 MiB, v7x: 64 MiB)."""
    try:
        info = pltpu.get_tpu_info()
        return int(getattr(info, "vmem_capacity_bytes", default))
    except Exception:  # not on TPU / older API -> conservative fallback
        return default


def _mm3(x3, w):
    """(H, W, C) @ (C, D) -> (H, W, D) with f32 MXU accumulation.

    Flattens to 2-D only when W is sublane-aligned (multiple of 8) so the reshape is a
    layout no-op; otherwise contracts the last axis directly to avoid a relayout copy
    (MobileNet 14x14 / 7x7 stages).
    """
    H, W, C = x3.shape
    if W % 8 == 0:
        y = jnp.dot(x3.reshape(H * W, C), w, preferred_element_type=jnp.float32)
        return y.reshape(H, W, w.shape[-1])
    return jax.lax.dot_general(
        x3, w, dimension_numbers=(((2,), (0,)), ((), ())),
        preferred_element_type=jnp.float32)


# ---------------------------------------------------------------------------
# Fused kernel: expand (1x1) -> depthwise 3x3 -> project (1x1), one image per step
# ---------------------------------------------------------------------------
def _fused_block_kernel(*refs, stride, expand, use_res):
    if expand:
        (x_ref, w1_ref, b1_ref, wdw_ref, b2_ref, w2_ref, b3_ref,
         out_ref, hp_ref) = refs
    else:
        (x_ref, wdw_ref, b2_ref, w2_ref, b3_ref, out_ref, hp_ref) = refs

    _, H, W, Cin = x_ref.shape
    _, Ho, Wo, Cout = out_ref.shape
    Ch = hp_ref.shape[-1]

    x3 = x_ref[...].reshape(H, W, Cin)                                  # bf16

    # ---- stage 1: 1x1 expand (bf16 MXU, f32 acc) + folded BN + ReLU.
    # Hidden activation is stored bf16 in VMEM scratch; it never touches HBM.
    if expand:
        h = _mm3(x3, w1_ref[...])                                       # (H, W, Ch) f32
        h = jnp.maximum(h + b1_ref[...], 0.0)
        hp_ref[1:H + 1, :, :] = h.astype(hp_ref.dtype)
    else:
        # expand_ratio == 1: cheap bf16 copy into the haloed scratch.
        hp_ref[1:H + 1, :, :] = x3.astype(hp_ref.dtype)

    # Zero H-halo rows; the W-halo is handled with pltpu.roll + edge masks below.
    zrow = jnp.zeros((1, W, Ch), hp_ref.dtype)
    hp_ref[0:1, :, :] = zrow
    hp_ref[H + 1:H + 2, :, :] = zrow

    # ---- stage 2: 3x3 depthwise conv (f32 VPU, column shifts on the XLU) + BN + ReLU.
    col = jax.lax.broadcasted_iota(jnp.int32, (1, W, Ch), 1)
    lmask = (col > 0).astype(jnp.float32)        # zero the wrapped column at x == 0
    rmask = (col < W - 1).astype(jnp.float32)    # zero the wrapped column at x == W-1

    acc = None                                    # vreg accumulation (no VMEM acc ref)
    for dy in range(3):
        slab = hp_ref[dy:dy + H, :, :]                                  # (H, W, Ch) bf16
        if stride == 2:
            # Only even output rows are needed: padded rows 2*r + dy (r = 0..Ho-1).
            # TODO(synk): a strided ref read (pl.ds(dy, Ho, stride=2)) would also halve
            #             the depthwise VMEM load traffic.
            slab = slab.reshape(Ho, 2, W, Ch)[:, 0, :, :]
        rows = slab.astype(jnp.float32)                                 # (Ho|H, W, Ch)

        w_l = wdw_ref[3 * dy + 0:3 * dy + 1, :].reshape(1, 1, Ch) * lmask
        w_c = wdw_ref[3 * dy + 1:3 * dy + 2, :].reshape(1, 1, Ch)
        w_r = wdw_ref[3 * dy + 2:3 * dy + 3, :].reshape(1, 1, Ch) * rmask

        term = rows * w_c
        term = term + pltpu.roll(rows, shift=1, axis=1) * w_l       # h[..., x-1, :]
        term = term + pltpu.roll(rows, shift=W - 1, axis=1) * w_r   # h[..., x+1, :]
        acc = term if acc is None else acc + term

    if stride == 2:
        # Single column subsample of the already row-reduced result.
        acc = acc.reshape(Ho, Wo, 2, Ch)[:, :, 0, :]
    y = jnp.maximum(acc + b2_ref[...].reshape(1, 1, Ch), 0.0)          # (Ho, Wo, Ch)

    # ---- stage 3: 1x1 project (bf16 MXU, f32 acc) + folded BN, optional residual (f32).
    p = _mm3(y.astype(jnp.bfloat16), w2_ref[...]) + b3_ref[...]
    if use_res:
        p = p + x3.astype(jnp.float32)
    out_ref[...] = p.reshape(1, Ho, Wo, Cout).astype(out_ref.dtype)


# ---------------------------------------------------------------------------
# BN folding helper
# ---------------------------------------------------------------------------
def fold_bn(gamma, beta, mean, var, eps=1e-5):
    scale = gamma / jnp.sqrt(var + eps)
    shift = beta - mean * scale
    return scale, shift


# ---------------------------------------------------------------------------
# InvertedResidual forward (wrapper: layout, BN folding, channel padding, pallas_call)
# ---------------------------------------------------------------------------
def inverted_residual_forward(x_nchw, params, *, inp, oup, stride, expand_ratio,
                              out_dtype=jnp.float32):
    assert stride in (1, 2)
    hidden = int(round(inp * expand_ratio))
    expand = expand_ratio != 1
    use_res = (stride == 1) and (inp == oup)

    N, C, H, W = x_nchw.shape
    assert C == inp
    if stride == 2:
        assert H % 2 == 0 and W % 2 == 0
    Ho, Wo = (H, W) if stride == 1 else (H // 2, W // 2)

    # TODO(synk): channels are padded to lane-dense 128; for tiny channel counts (the
    # toy 4 -> 128) most MXU/VALU/DMA work is on zero lanes.  Real MobileNetV2 hidden
    # sizes (96..960) waste far less; hidden <= 64 would need a spatial-in-lanes
    # depthwise layout to remove the waste.
    Cin_p, Ch_p, Cout_p = _round_up(inp), _round_up(hidden), _round_up(oup)

    # TODO(synk): when chaining blocks, keep activations in this NHWC / bf16 /
    # channel-padded layout between pallas_calls instead of transposing + padding per
    # block (the transposes/pads below are full-tensor HBM round trips in XLA).
    x_nhwc = jnp.transpose(x_nchw, (0, 2, 3, 1))
    x_p = jnp.pad(x_nhwc, ((0, 0), (0, 0), (0, 0), (0, Cin_p - inp))).astype(jnp.bfloat16)

    # Fold BN scale into the conv weights; kernel epilogues are only "+ shift" (+ ReLU).
    s2, t2 = fold_bn(*params["bn2"])
    wdw = jnp.pad(params["w_dw"] * s2[None, :],
                  ((0, 0), (0, Ch_p - hidden))).astype(jnp.float32)
    b2 = jnp.pad(t2, (0, Ch_p - hidden)).reshape(1, Ch_p).astype(jnp.float32)

    s3, t3 = fold_bn(*params["bn3"])
    w2 = jnp.pad(params["w2"] * s3[None, :],
                 ((0, Ch_p - hidden), (0, Cout_p - oup))).astype(jnp.bfloat16)
    b3 = jnp.pad(t3, (0, Cout_p - oup)).reshape(1, Cout_p).astype(jnp.float32)

    inputs = [x_p]
    in_specs = [pl.BlockSpec((1, H, W, Cin_p), lambda n: (n, 0, 0, 0))]

    if expand:
        s1, t1 = fold_bn(*params["bn1"])
        w1 = jnp.pad(params["w1"] * s1[None, :],
                     ((0, Cin_p - inp), (0, Ch_p - hidden))).astype(jnp.bfloat16)
        b1 = jnp.pad(t1, (0, Ch_p - hidden)).reshape(1, Ch_p).astype(jnp.float32)
        inputs += [w1, b1]
        in_specs += [pl.BlockSpec((Cin_p, Ch_p), lambda n: (0, 0)),
                     pl.BlockSpec((1, Ch_p), lambda n: (0, 0))]

    # TODO(synk): these constant-index weight/bias blocks are still double-buffered;
    #             pipeline_mode=pl.Buffered(1) (or a one-shot copy into scratch) would
    #             save a few hundred KB of VMEM headroom on v7x.
    inputs += [wdw, b2, w2, b3]
    in_specs += [pl.BlockSpec((9, Ch_p), lambda n: (0, 0)),
                 pl.BlockSpec((1, Ch_p), lambda n: (0, 0)),
                 pl.BlockSpec((Ch_p, Cout_p), lambda n: (0, 0)),
                 pl.BlockSpec((1, Cout_p), lambda n: (0, 0))]

    out_spec = pl.BlockSpec((1, Ho, Wo, Cout_p), lambda n: (n, 0, 0, 0))
    out_itemsize = jnp.dtype(out_dtype).itemsize

    # Hidden activation (H-halo padded), bf16 -> half the scratch of the f32 version.
    scratch_shapes = [pltpu.VMEM((H + 2, W, Ch_p), jnp.bfloat16)]

    # VMEM budget: 2x (double-buffer) of the per-step blocks + persistent scratch.
    blk_bytes = (H * W * Cin_p * 2 + Ho * Wo * Cout_p * out_itemsize
                 + (Cin_p * Ch_p * 2 if expand else 0) + Ch_p * Cout_p * 2
                 + 9 * Ch_p * 4 + 2 * Ch_p * 4 + Cout_p * 4)
    needed = 2 * blk_bytes + (H + 2) * W * Ch_p * 2
    cap = (_vmem_capacity_bytes() * 3) // 4   # leave headroom for Mosaic internal scratch
    vmem_limit = int(min(max(needed + (8 << 20), 32 << 20), cap))

    kern = functools.partial(_fused_block_kernel,
                             stride=stride, expand=expand, use_res=use_res)

    out_p = pl.pallas_call(
        kern,
        out_shape=jax.ShapeDtypeStruct((N, Ho, Wo, Cout_p), out_dtype),
        grid_spec=pltpu.PrefetchScalarGridSpec(
            num_scalar_prefetch=0,
            grid=(N,),
            in_specs=in_specs,
            out_specs=out_spec,
            scratch_shapes=scratch_shapes),
        compiler_params=pltpu.CompilerParams(
            dimension_semantics=("parallel",),
            vmem_limit_bytes=vmem_limit),
    )(*inputs)

    out = out_p[:, :, :, :oup]
    return jnp.transpose(out, (0, 3, 1, 2))  # back to NCHW


# ---------------------------------------------------------------------------
# Pure-JAX f32 reference (for correctness check)
# ---------------------------------------------------------------------------
def reference_forward(x_nchw, params, *, inp, oup, stride, expand_ratio, **_):
    hidden = int(round(inp * expand_ratio))
    use_res = (stride == 1) and (inp == oup)
    x = jnp.transpose(x_nchw, (0, 2, 3, 1))

    h = x
    if expand_ratio != 1:
        s1, b1 = fold_bn(*params["bn1"])
        h = jnp.maximum(jnp.einsum("nhwc,cd->nhwd", h, params["w1"]) * s1 + b1, 0.0)

    s2, b2 = fold_bn(*params["bn2"])
    wdw = params["w_dw"].reshape(3, 3, 1, hidden)  # HWIO, feature_group_count=hidden
    h = jax.lax.conv_general_dilated(
        h, wdw, window_strides=(stride, stride), padding=((1, 1), (1, 1)),
        dimension_numbers=("NHWC", "HWIO", "NHWC"), feature_group_count=hidden)
    h = jnp.maximum(h * s2 + b2, 0.0)

    s3, b3 = fold_bn(*params["bn3"])
    o = jnp.einsum("nhwc,cd->nhwd", h, params["w2"]) * s3 + b3
    if use_res:
        o = o + x
    return jnp.transpose(o, (0, 3, 1, 2))


# ---------------------------------------------------------------------------
# Deterministic parameter init
# ---------------------------------------------------------------------------
def make_params(key, inp, oup, expand_ratio):
    hidden = int(round(inp * expand_ratio))
    ks = jax.random.split(key, 6)

    def bn(k, c):
        k1, k2, k3, k4 = jax.random.split(k, 4)
        gamma = 1.0 + 0.1 * jax.random.normal(k1, (c,), jnp.float32)
        beta = 0.1 * jax.random.normal(k2, (c,), jnp.float32)
        mean = 0.1 * jax.random.normal(k3, (c,), jnp.float32)
        var = 0.5 + jnp.abs(jax.random.normal(k4, (c,), jnp.float32))
        return (gamma, beta, mean, var)

    return {
        # 1x1 expand conv: torch weight (hidden, inp, 1, 1) -> (inp, hidden)
        "w1": 0.2 * jax.random.normal(ks[0], (inp, hidden), jnp.float32),
        "bn1": bn(ks[1], hidden),
        # 3x3 depthwise: torch weight (hidden, 1, 3, 3) -> (9, hidden), row k = ky*3+kx
        "w_dw": 0.2 * jax.random.normal(ks[2], (9, hidden), jnp.float32),
        "bn2": bn(ks[3], hidden),
        # 1x1 project conv: torch weight (oup, hidden, 1, 1) -> (hidden, oup)
        "w2": 0.2 * jax.random.normal(ks[4], (hidden, oup), jnp.float32),
        "bn3": bn(ks[5], oup),
    }


if __name__ == "__main__":
    key = jax.random.PRNGKey(0)
    N, H, W = 2, 16, 16

    configs = [
        dict(inp=4, oup=4, stride=1, expand_ratio=2),   # residual path
        dict(inp=4, oup=8, stride=2, expand_ratio=6),   # downsample, no residual
        dict(inp=8, oup=8, stride=1, expand_ratio=1),   # no expand conv
    ]

    for i, cfg in enumerate(configs):
        kx, kp = jax.random.split(jax.random.fold_in(key, i))
        x = jax.random.normal(kx, (N, cfg["inp"], H, W), jnp.float32)  # NCHW like PyTorch
        params = make_params(kp, cfg["inp"], cfg["oup"], cfg["expand_ratio"])

        out = jax.block_until_ready(inverted_residual_forward(x, params, **cfg))
        ref = jax.block_until_ready(reference_forward(x, params, **cfg))

        Ho = H if cfg["stride"] == 1 else H // 2
        Wo = W if cfg["stride"] == 1 else W // 2
        assert out.shape == (N, cfg["oup"], Ho, Wo), (cfg, out.shape)

        # bf16 MXU operands (f32 accumulation) and bf16 hidden storage -> relative
        # tolerance against the f32 reference.
        err = float(jnp.max(jnp.abs(out - ref)))
        tol = 2e-2 * max(1.0, float(jnp.max(jnp.abs(ref))))
        assert err < tol, (cfg, err, tol)

    print("KERNEL_OK")
</pallas_src>

<mosaic_0001>
module attributes {stable_mosaic.version = 11 : i64} {
  func.func @_fused_block_kernel(%arg0: i32, %arg1: memref<1x16x16x128xbf16, #tpu.memory_space<vmem>>, %arg2: memref<128x128xbf16, #tpu.memory_space<vmem>>, %arg3: memref<1x128xf32, #tpu.memory_space<vmem>>, %arg4: memref<9x128xf32, #tpu.memory_space<vmem>>, %arg5: memref<1x128xf32, #tpu.memory_space<vmem>>, %arg6: memref<128x128xbf16, #tpu.memory_space<vmem>>, %arg7: memref<1x128xf32, #tpu.memory_space<vmem>>, %arg8: memref<1x16x16x128xf32, #tpu.memory_space<vmem>>, %arg9: memref<18x16x128xbf16, #tpu.memory_space<vmem>>) attributes {dimension_semantics = [#tpu.dimension_semantics<parallel>], iteration_bounds = array<i64: 2>, scalar_prefetch = 0 : i64, scratch_operands = 1 : i64, tpu.core_type = #tpu.core_type<tc>, window_params = [{transform_indices = @transform_0, window_bounds = array<i64: 1, 16, 16, 128>}, {pipeline_mode = #tpu.pipeline_mode<synchronous>, transform_indices = @transform_1, window_bounds = array<i64: 128, 128>}, {pipeline_mode = #tpu.pipeline_mode<synchronous>, transform_indices = @transform_2, window_bounds = array<i64: 1, 128>}, {pipeline_mode = #tpu.pipeline_mode<synchronous>, transform_indices = @transform_3, window_bounds = array<i64: 9, 128>}, {pipeline_mode = #tpu.pipeline_mode<synchronous>, transform_indices = @transform_4, window_bounds = array<i64: 1, 128>}, {pipeline_mode = #tpu.pipeline_mode<synchronous>, transform_indices = @transform_5, window_bounds = array<i64: 128, 128>}, {pipeline_mode = #tpu.pipeline_mode<synchronous>, transform_indices = @transform_6, window_bounds = array<i64: 1, 128>}, {transform_indices = @transform_7, window_bounds = array<i64: 1, 16, 16, 128>}]} {
    %c0 = arith.constant 0 : index
    %c0_0 = arith.constant 0 : index
    %c0_1 = arith.constant 0 : index
    %c0_2 = arith.constant 0 : index
    %0 = vector.load %arg1[%c0, %c0_0, %c0_1, %c0_2] : memref<1x16x16x128xbf16, #tpu.memory_space<vmem>>, vector<1x16x16x128xbf16>
    %1 = vector.shape_cast %0 : vector<1x16x16x128xbf16> to vector<16x16x128xbf16>
    %c0_3 = arith.constant 0 : index
    %c0_4 = arith.constant 0 : index
    %2 = vector.load %arg2[%c0_3, %c0_4] : memref<128x128xbf16, #tpu.memory_space<vmem>>, vector<128x128xbf16>
    %3 = vector.shape_cast %1 : vector<16x16x128xbf16> to vector<256x128xbf16>
    %cst = arith.constant dense<0.000000e+00> : vector<256x128xf32>
    %4 = tpu.matmul %3, %2, %cst {dimension_numbers = #tpu.dot_dimension_numbers<[1], [0], [0], [1], [0, 0, 1, 1], [], []>} : vector<256x128xbf16>, vector<128x128xbf16>, vector<256x128xf32> -> vector<256x128xf32>
    %5 = vector.shape_cast %4 : vector<256x128xf32> to vector<16x16x128xf32>
    %c0_5 = arith.constant 0 : index
    %c0_6 = arith.constant 0 : index
    %6 = vector.load %arg3[%c0_5, %c0_6] : memref<1x128xf32, #tpu.memory_space<vmem>>, vector<1x128xf32>
    %7 = vector.shape_cast %6 : vector<1x128xf32> to vector<1x1x128xf32>
    %8 = vector.broadcast %7 : vector<1x1x128xf32> to vector<16x16x128xf32>
    %9 = arith.addf %5, %8 : vector<16x16x128xf32>
    %cst_7 = arith.constant 0.000000e+00 : f32
    %10 = vector.broadcast %cst_7 : f32 to vector<16x16x128xf32>
    %11 = arith.maximumf %9, %10 : vector<16x16x128xf32>
    %12 = arith.truncf %11 : vector<16x16x128xf32> to vector<16x16x128xbf16>
    %c1 = arith.constant 1 : index
    %c0_8 = arith.constant 0 : index
    %c0_9 = arith.constant 0 : index
    %13 = vector.load %arg9[%c1, %c0_8, %c0_9] : memref<18x16x128xbf16, #tpu.memory_space<vmem>>, vector<16x16x128xbf16>
    tpu.vector_store %arg9[%c1, %c0_8, %c0_9], %12 {strides = array<i32>} : memref<18x16x128xbf16, #tpu.memory_space<vmem>>, vector<16x16x128xbf16>,
    %cst_10 = arith.constant 0.000000e+00 : bf16
    %14 = vector.broadcast %cst_10 : bf16 to vector<1x16x128xbf16>
    %c0_11 = arith.constant 0 : index
    %c0_12 = arith.constant 0 : index
    %c0_13 = arith.constant 0 : index
    %15 = vector.load %arg9[%c0_11, %c0_12, %c0_13] : memref<18x16x128xbf16, #tpu.memory_space<vmem>>, vector<1x16x128xbf16>
    tpu.vector_store %arg9[%c0_11, %c0_12, %c0_13], %14 {strides = array<i32>} : memref<18x16x128xbf16, #tpu.memory_space<vmem>>, vector<1x16x128xbf16>,
    %c17 = arith.constant 17 : index
    %c0_14 = arith.constant 0 : index
    %c0_15 = arith.constant 0 : index
    %16 = vector.load %arg9[%c17, %c0_14, %c0_15] : memref<18x16x128xbf16, #tpu.memory_space<vmem>>, vector<1x16x128xbf16>
    tpu.vector_store %arg9[%c17, %c0_14, %c0_15], %14 {strides = array<i32>} : memref<18x16x128xbf16, #tpu.memory_space<vmem>>, vector<1x16x128xbf16>,
    %17 = tpu.iota {dimensions = array<i32: 1>} : vector<1x16x128xi32>
    %c0_i32 = arith.constant 0 : i32
    %18 = vector.broadcast %c0_i32 : i32 to vector<1x16x128xi32>
    %19 = arith.cmpi sgt, %17, %18 : vector<1x16x128xi32>
    %20 = arith.extui %19 : vector<1x16x128xi1> to vector<1x16x128xi32>
    %21 = arith.sitofp %20 : vector<1x16x128xi32> to vector<1x16x128xf32>
    %c15_i32 = arith.constant 15 : i32
    %22 = vector.broadcast %c15_i32 : i32 to vector<1x16x128xi32>
    %23 = arith.cmpi slt, %17, %22 : vector<1x16x128xi32>
    %24 = arith.extui %23 : vector<1x16x128xi1> to vector<1x16x128xi32>
    %25 = arith.sitofp %24 : vector<1x16x128xi32> to vector<1x16x128xf32>
    %c0_16 = arith.constant 0 : index
    %c0_17 = arith.constant 0 : index
    %c0_18 = arith.constant 0 : index
    %26 = vector.load %arg9[%c0_16, %c0_17, %c0_18] : memref<18x16x128xbf16, #tpu.memory_space<vmem>>, vector<16x16x128xbf16>
    %27 = arith.extf %26 : vector<16x16x128xbf16> to vector<16x16x128xf32>
    %c0_19 = arith.constant 0 : index
    %c0_20 = arith.constant 0 : index
    %28 = vector.load %arg4[%c0_19, %c0_20] : memref<9x128xf32, #tpu.memory_space<vmem>>, vector<1x128xf32>
    %29 = vector.shape_cast %28 : vector<1x128xf32> to vector<1x1x128xf32>
    %30 = vector.broadcast %29 : vector<1x1x128xf32> to vector<1x16x128xf32>
    %31 = arith.mulf %30, %21 : vector<1x16x128xf32>
    %c1_21 = arith.constant 1 : index
    %c0_22 = arith.constant 0 : index
    %32 = vector.load %arg4[%c1_21, %c0_22] : memref<9x128xf32, #tpu.memory_space<vmem>>, vector<1x128xf32>
    %33 = vector.shape_cast %32 : vector<1x128xf32> to vector<1x1x128xf32>
    %c2 = arith.constant 2 : index
    %c0_23 = arith.constant 0 : index
    %34 = vector.load %arg4[%c2, %c0_23] : memref<9x128xf32, #tpu.memory_space<vmem>>, vector<1x128xf32>
    %35 = vector.shape_cast %34 : vector<1x128xf32> to vector<1x1x128xf32>
    %36 = vector.broadcast %35 : vector<1x1x128xf32> to vector<1x16x128xf32>
    %37 = arith.mulf %36, %25 : vector<1x16x128xf32>
    %38 = vector.broadcast %33 : vector<1x1x128xf32> to vector<16x16x128xf32>
    %39 = arith.mulf %27, %38 : vector<16x16x128xf32>
    %c1_i32 = arith.constant 1 : i32
    %40 = tpu.dynamic_rotate %27 by %c1_i32 dim 1 : vector<16x16x128xf32>, i32 -> vector<16x16x128xf32>
    %41 = vector.broadcast %31 : vector<1x16x128xf32> to vector<16x16x128xf32>
    %42 = arith.mulf %40, %41 : vector<16x16x128xf32>
    %43 = arith.addf %39, %42 : vector<16x16x128xf32>
    %c15_i32_24 = arith.constant 15 : i32
    %44 = tpu.dynamic_rotate %27 by %c15_i32_24 dim 1 : vector<16x16x128xf32>, i32 -> vector<16x16x128xf32>
    %45 = vector.broadcast %37 : vector<1x16x128xf32> to vector<16x16x128xf32>
    %46 = arith.mulf %44, %45 : vector<16x16x128xf32>
    %47 = arith.addf %43, %46 : vector<16x16x128xf32>
    %c1_25 = arith.constant 1 : index
    %c0_26 = arith.constant 0 : index
    %c0_27 = arith.constant 0 : index
    %48 = vector.load %arg9[%c1_25, %c0_26, %c0_27] : memref<18x16x128xbf16, #tpu.memory_space<vmem>>, vector<16x16x128xbf16>
    %49 = arith.extf %48 : vector<16x16x128xbf16> to vector<16x16x128xf32>
    %c3 = arith.constant 3 : index
    %c0_28 = arith.constant 0 : index
    %50 = vector.load %arg4[%c3, %c0_28] : memref<9x128xf32, #tpu.memory_space<vmem>>, vector<1x128xf32>
    %51 = vector.shape_cast %50 : vector<1x128xf32> to vector<1x1x128xf32>
    %52 = vector.broadcast %51 : vector<1x1x128xf32> to vector<1x16x128xf32>
    %53 = arith.mulf %52, %21 : vector<1x16x128xf32>
    %c4 = arith.constant 4 : index
    %c0_29 = arith.constant 0 : index
    %54 = vector.load %arg4[%c4, %c0_29] : memref<9x128xf32, #tpu.memory_space<vmem>>, vector<1x128xf32>
    %55 = vector.shape_cast %54 : vector<1x128xf32> to vector<1x1x128xf32>
    %c5 = arith.constant 5 : index
    %c0_30 = arith.constant 0 : index
    %56 = vector.load %arg4[%c5, %c0_30] : memref<9x128xf32, #tpu.memory_space<vmem>>, vector<1x128xf32>
    %57 = vector.shape_cast %56 : vector<1x128xf32> to vector<1x1x128xf32>
    %58 = vector.broadcast %57 : vector<1x1x128xf32> to vector<1x16x128xf32>
    %59 = arith.mulf %58, %25 : vector<1x16x128xf32>
    %60 = vector.broadcast %55 : vector<1x1x128xf32> to vector<16x16x128xf32>
    %61 = arith.mulf %49, %60 : vector<16x16x128xf32>
    %c1_i32_31 = arith.constant 1 : i32
    %62 = tpu.dynamic_rotate %49 by %c1_i32_31 dim 1 : vector<16x16x128xf32>, i32 -> vector<16x16x128xf32>
    %63 = vector.broadcast %53 : vector<1x16x128xf32> to vector<16x16x128xf32>
    %64 = arith.mulf %62, %63 : vector<16x16x128xf32>
    %65 = arith.addf %61, %64 : vector<16x16x128xf32>
    %c15_i32_32 = arith.constant 15 : i32
    %66 = tpu.dynamic_rotate %49 by %c15_i32_32 dim 1 : vector<16x16x128xf32>, i32 -> vector<16x16x128xf32>
    %67 = vector.broadcast %59 : vector<1x16x128xf32> to vector<16x16x128xf32>
    %68 = arith.mulf %66, %67 : vector<16x16x128xf32>
    %69 = arith.addf %65, %68 : vector<16x16x128xf32>
    %70 = arith.addf %47, %69 : vector<16x16x128xf32>
    %c2_33 = arith.constant 2 : index
    %c0_34 = arith.constant 0 : index
    %c0_35 = arith.constant 0 : index
    %71 = vector.load %arg9[%c2_33, %c0_34, %c0_35] : memref<18x16x128xbf16, #tpu.memory_space<vmem>>, vector<16x16x128xbf16>
    %72 = arith.extf %71 : vector<16x16x128xbf16> to vector<16x16x128xf32>
    %c6 = arith.constant 6 : index
    %c0_36 = arith.constant 0 : index
    %73 = vector.load %arg4[%c6, %c0_36] : memref<9x128xf32, #tpu.memory_space<vmem>>, vector<1x128xf32>
    %74 = vector.shape_cast %73 : vector<1x128xf32> to vector<1x1x128xf32>
    %75 = vector.broadcast %74 : vector<1x1x128xf32> to vector<1x16x128xf32>
    %76 = arith.mulf %75, %21 : vector<1x16x128xf32>
    %c7 = arith.constant 7 : index
    %c0_37 = arith.constant 0 : index
    %77 = vector.load %arg4[%c7, %c0_37] : memref<9x128xf32, #tpu.memory_space<vmem>>, vector<1x128xf32>
    %78 = vector.shape_cast %77 : vector<1x128xf32> to vector<1x1x128xf32>
    %c8 = arith.constant 8 : index
    %c0_38 = arith.constant 0 : index
    %79 = vector.load %arg4[%c8, %c0_38] : memref<9x128xf32, #tpu.memory_space<vmem>>, vector<1x128xf32>
    %80 = vector.shape_cast %79 : vector<1x128xf32> to vector<1x1x128xf32>
    %81 = vector.broadcast %80 : vector<1x1x128xf32> to vector<1x16x128xf32>
    %82 = arith.mulf %81, %25 : vector<1x16x128xf32>
    %83 = vector.broadcast %78 : vector<1x1x128xf32> to vector<16x16x128xf32>
    %84 = arith.mulf %72, %83 : vector<16x16x128xf32>
    %c1_i32_39 = arith.constant 1 : i32
    %85 = tpu.dynamic_rotate %72 by %c1_i32_39 dim 1 : vector<16x16x128xf32>, i32 -> vector<16x16x128xf32>
    %86 = vector.broadcast %76 : vector<1x16x128xf32> to vector<16x16x128xf32>
    %87 = arith.mulf %85, %86 : vector<16x16x128xf32>
    %88 = arith.addf %84, %87 : vector<16x16x128xf32>
    %c15_i32_40 = arith.constant 15 : i32
    %89 = tpu.dynamic_rotate %72 by %c15_i32_40 dim 1 : vector<16x16x128xf32>, i32 -> vector<16x16x128xf32>
    %90 = vector.broadcast %82 : vector<1x16x128xf32> to vector<16x16x128xf32>
    %91 = arith.mulf %89, %90 : vector<16x16x128xf32>
    %92 = arith.addf %88, %91 : vector<16x16x128xf32>
    %93 = arith.addf %70, %92 : vector<16x16x128xf32>
    %c0_41 = arith.constant 0 : index
    %c0_42 = arith.constant 0 : index
    %94 = vector.load %arg5[%c0_41, %c0_42] : memref<1x128xf32, #tpu.memory_space<vmem>>, vector<1x128xf32>
    %95 = vector.shape_cast %94 : vector<1x128xf32> to vector<1x1x128xf32>
    %96 = vector.broadcast %95 : vector<1x1x128xf32> to vector<16x16x128xf32>
    %97 = arith.addf %93, %96 : vector<16x16x128xf32>
    %cst_43 = arith.constant 0.000000e+00 : f32
    %98 = vector.broadcast %cst_43 : f32 to vector<16x16x128xf32>
    %99 = arith.maximumf %97, %98 : vector<16x16x128xf32>
    %100 = arith.truncf %99 : vector<16x16x128xf32> to vector<16x16x128xbf16>
    %c0_44 = arith.constant 0 : index
    %c0_45 = arith.constant 0 : index
    %101 = vector.load %arg6[%c0_44, %c0_45] : memref<128x128xbf16, #tpu.memory_space<vmem>>, vector<128x128xbf16>
    %102 = vector.shape_cast %100 : vector<16x16x128xbf16> to vector<256x128xbf16>
    %cst_46 = arith.constant dense<0.000000e+00> : vector<256x128xf32>
    %103 = tpu.matmul %102, %101, %cst_46 {dimension_numbers = #tpu.dot_dimension_numbers<[1], [0], [0], [1], [0, 0, 1, 1], [], []>} : vector<256x128xbf16>, vector<128x128xbf16>, vector<256x128xf32> -> vector<256x128xf32>
    %104 = vector.shape_cast %103 : vector<256x128xf32> to vector<16x16x128xf32>
    %c0_47 = arith.constant 0 : index
    %c0_48 = arith.constant 0 : index
    %105 = vector.load %arg7[%c0_47, %c0_48] : memref<1x128xf32, #tpu.memory_space<vmem>>, vector<1x128xf32>
    %106 = vector.shape_cast %105 : vector<1x128xf32> to vector<1x1x128xf32>
    %107 = vector.broadcast %106 : vector<1x1x128xf32> to vector<16x16x128xf32>
    %108 = arith.addf %104, %107 : vector<16x16x128xf32>
    %109 = arith.extf %1 : vector<16x16x128xbf16> to vector<16x16x128xf32>
    %110 = arith.addf %108, %109 : vector<16x16x128xf32>
    %111 = vector.shape_cast %110 : vector<16x16x128xf32> to vector<1x16x16x128xf32>
    %c0_49 = arith.constant 0 : index
    %c0_50 = arith.constant 0 : index
    %c0_51 = arith.constant 0 : index
    %c0_52 = arith.constant 0 : index
    %112 = vector.load %arg8[%c0_49, %c0_50, %c0_51, %c0_52] : memref<1x16x16x128xf32, #tpu.memory_space<vmem>>, vector<1x16x16x128xf32>
    tpu.vector_store %arg8[%c0_49, %c0_50, %c0_51, %c0_52], %111 {strides = array<i32>} : memref<1x16x16x128xf32, #tpu.memory_space<vmem>>, vector<1x16x16x128xf32>,
    return
  }
  func.func @transform_0(%arg0: i32) -> (i32, i32, i32, i32) {
    %c0_i32 = arith.constant 0 : i32
    %c0_i32_0 = arith.constant 0 : i32
    %c0_i32_1 = arith.constant 0 : i32
    %c0_i32_2 = arith.constant 0 : i32
    return %arg0, %c0_i32, %c0_i32_0, %c0_i32_1 : i32, i32, i32, i32
  }
  func.func @transform_1(%arg0: i32) -> (i32, i32) {
    %c0_i32 = arith.constant 0 : i32
    %c0_i32_0 = arith.constant 0 : i32
    %c0_i32_1 = arith.constant 0 : i32
    return %c0_i32, %c0_i32_0 : i32, i32
  }
  func.func @transform_2(%arg0: i32) -> (i32, i32) {
    %c0_i32 = arith.constant 0 : i32
    %c0_i32_0 = arith.constant 0 : i32
    %c0_i32_1 = arith.constant 0 : i32
    return %c0_i32, %c0_i32_0 : i32, i32
  }
  func.func @transform_3(%arg0: i32) -> (i32, i32) {
    %c0_i32 = arith.constant 0 : i32
    %c0_i32_0 = arith.constant 0 : i32
    %c0_i32_1 = arith.constant 0 : i32
    return %c0_i32, %c0_i32_0 : i32, i32
  }
  func.func @transform_4(%arg0: i32) -> (i32, i32) {
    %c0_i32 = arith.constant 0 : i32
    %c0_i32_0 = arith.constant 0 : i32
    %c0_i32_1 = arith.constant 0 : i32
    return %c0_i32, %c0_i32_0 : i32, i32
  }
  func.func @transform_5(%arg0: i32) -> (i32, i32) {
    %c0_i32 = arith.constant 0 : i32
    %c0_i32_0 = arith.constant 0 : i32
    %c0_i32_1 = arith.constant 0 : i32
    return %c0_i32, %c0_i32_0 : i32, i32
  }
  func.func @transform_6(%arg0: i32) -> (i32, i32) {
    %c0_i32 = arith.constant 0 : i32
    %c0_i32_0 = arith.constant 0 : i32
    %c0_i32_1 = arith.constant 0 : i32
    return %c0_i32, %c0_i32_0 : i32, i32
  }
  func.func @transform_7(%arg0: i32) -> (i32, i32, i32, i32) {
    %c0_i32 = arith.constant 0 : i32
    %c0_i32_0 = arith.constant 0 : i32
    %c0_i32_1 = arith.constant 0 : i32
    %c0_i32_2 = arith.constant 0 : i32
    return %arg0, %c0_i32, %c0_i32_0, %c0_i32_1 : i32, i32, i32, i32
  }
}

</mosaic_0001>

<bundles_post_ra>
// kernel: tpu_custom_call.1
= control target key start
LH: loop header
LB: loop body
LE: loop exit
PB: predicated region body
PF: predicated region fallthrough
CT: control target
= control target key end

     0   :  { %s4855_s0 = inlined_call_operand.hbm [shape: bf16[2,16,16,128], index: 0, kind: input, shape index: {}]   ;;  %s4856_s1 = inlined_call_operand.hbm [shape: bf16[128,128], index: 1, kind: input, shape index: {}]   ;;  %s4857_s2 = inlined_call_operand.vmem [shape: f32[1,128], index: 2, kind: input, shape index: {}]   ;;  %s4858_s3 = inlined_call_operand.hbm [shape: f32[9,128], index: 3, kind: input, shape index: {}]   ;;  %s4859_s4 = inlined_call_operand.vmem [shape: f32[1,128], index: 4, kind: input, shape index: {}]   ;;  %s4860_s5 = inlined_call_operand.hbm [shape: bf16[128,128], index: 5, kind: input, shape index: {}]   ;;  %s4861_s6 = inlined_call_operand.vmem [shape: f32[1,128], index: 6, kind: input, shape index: {}]   ;;  %s4862_s7 = inlined_call_operand.hbm [shape: f32[2,16,16,128], index: 7, kind: output, shape index: {}]  }
   0x1   :  { %4869 = sst [smem:[#allocation16_spill]] %s4856_s1 }
   0x2   :  { %12 = vsyncpa [#allocation4], 0 }
   0x3   :  { %14 = vsyncpa [#allocation4 + $0x1], 0 }
   0x4   :  { %15 = vsyncpa [#allocation7], 0 }
   0x5   :  { %16 = vsyncpa [#allocation10], 0 }
   0x6   :  { %17 = vsyncpa [#allocation5], 0 }
   0x7   :  { %19 = vsyncpa [#allocation5 + $0x1], 0  ;;  %s3690_s24 = smov 0   ;;  %s3692_s25 = smov 0  }
   0x8   :  { %s3694_s26 = smov 0   ;;  %s3696_s27 = smov 0  }
   0x9 LB: > { %s3711_s28 = sadd.s32 4294967295, %s3635_s27   ;;  %s2690_s29 = sadd.s32 4294967294, %s3635_s27   ;;  %s3635_s27 = sphi %s3696_s27, %s4891_s27   ;;  %s3631_s26 = sphi %s3694_s26, %s4890_s26   ;;  %s3627_s25 = sphi %s3692_s25, %s4889_s25   ;;  %s3623_s24 = sphi %s3690_s24, %s4888_s24  }
   0xa   : > { %p45_p0 = scmp.ne.s32.totalorder %s3627_s25, %s3623_s24  ;;  %p4864_p1 = scmp.eq.s32.totalorder %s3711_s28, 0 }
   0xb   : > { %p195_p2 = scmp.eq.s32.totalorder %s3711_s28, 1  ;;  %p201_p3 = scmp.eq.s32.totalorder %s2690_s29, 1 }
   0xc   : > { %p3720_p4 = por %p4864_p1, %p45_p0  ;;  %p2691_p5 = scmp.ge.s32.totalorder %s3635_s27, 1 }
   0xd   : > { %p3725_p6 = por %p201_p3, %p45_p0  ;;  %p208_p7 = scmp.lt.s32.totalorder %s3635_s27, 3 }
   0xe   : > { %s4870_s30 = scalar_select %p3720_p4, 1, 0 }
   0xf   : > { %s4871_s8 = scalar_select %p3725_p6, 1, 0 }
  0x10   : > { %p3730_p8 = pnand %p2691_p5, %p208_p7  ;;  %s3637_s10 = smov [#allocation6]  }
  0x11   : > { %s220_s11 = sshll.u32 %s3637_s10, 4  ;;  %s3638_s13 = smov [#allocation8]   ;;  %s221_s11 = int_to_ptr.vmem [resolvable:$true] %s220_s11 }
  0x12   : > { %s4872_s9 = scalar_select %p3730_p8, 1, 0 }
  0x13   : > { %p3314_p9 = pneg %p3730_p8  ;;  %s236_s14 = sshll.u32 %s3638_s13, 4  ;;  %s237_s14 = int_to_ptr.vmem [resolvable:$true] %s236_s14 }
  0x14   : > { %s3468_s15 = scalar_lea.vmem %s221_s11, 1024  ;;  %p3476_p5 = scmp.lt.s32.totalorder %s221_s11, %s221_s11 }
  0x15   : > { %p3739_p11 = pnand %p3314_p9, %p4864_p1  ;;  %p3469_p13 = scmp.ne.s32.totalorder %s221_s11, %s3468_s15 }
  0x16   : > { %p3477_p7 = scmp.lt.s32.totalorder %s3468_s15, %s3468_s15 }
  0x17   : > { %p3459_p12 = pneg %p3739_p11 }
  0x18   : > { %p3478_p10 = por %p3477_p7, %p3476_p5 }
  0x19   : > { %p3471_p0 = pnand %p3469_p13, %p3459_p12 }
  0x1b   : > { %p3472_p3 = pneg %p3471_p0 }
  0x1d   : > { %p3479_p9 = pnand %p3478_p10, %p3472_p3 }
  0x1f   : > { %3482 = shalt.err (!%p3479_p9)
}
  0x20   : > { %s4863_s16 = smov 64   ;;  %s4865_s17 = smov 4  }
  0x21   : > { %s4874_s1 = sld [smem:[#allocation16_spill]]  ;;  %s3494_s20 = scalar_lea.vmem %s237_s14, 256 }
  0x22   : > { %p3495_p13 = scmp.ne.s32.totalorder %s237_s14, %s3494_s20  ;;  %p3502_p10 = scmp.lt.s32.totalorder %s237_s14, %s237_s14 }
  0x23   : > { %p3503_p3 = scmp.lt.s32.totalorder %s3494_s20, %s3494_s20 }
  0x24   : > { %p3497_p0 = pnand %p3495_p13, %p3459_p12 }
  0x25   : > { %p3504_p7 = por %p3503_p3, %p3502_p10 }
  0x26   : > { %p3498_p5 = pneg %p3497_p0 }
  0x27   : > { %3317 = dma.hbm_to_vmem [thread:$0]  (!%p3739_p11), %s4874_s1, 1024, %s221_s11, [#allocation7], %s4863_s16, %s4863_s16, %s4865_s17  }
  0x28   : > { %p3505_p9 = pnand %p3504_p7, %p3498_p5 }
  0x2a   : > { %3508 = shalt.err (!%p3505_p9)
}
  0x2b   : > { %s3641_s21 = smov 128   ;;  %s3642_s22 = smov 8  }
  0x2c   : > { %3320 = dma.hbm_to_vmem [thread:$0]  (!%p3739_p11), %s4858_s3, 256, %s237_s14, [#allocation7], %s3641_s21, %s3641_s21, %s3642_s22  }
  0x2d   : > { %s3643_s10 = smov [#allocation9]   ;;  %s3765_s13 = sadd.s32 1, %s3635_s27  }
  0x2e   : > { %s252_s11 = sshll.u32 %s3643_s10, 4  ;;  %s253_s11 = int_to_ptr.vmem [resolvable:$true] %s252_s11 }
  0x2f   : > { %s3520_s15 = scalar_lea.vmem %s253_s11, 1024  ;;  %p3528_p10 = scmp.lt.s32.totalorder %s253_s11, %s253_s11 }
  0x30   : > { %p3521_p13 = scmp.ne.s32.totalorder %s253_s11, %s3520_s15  ;;  %p3529_p3 = scmp.lt.s32.totalorder %s3520_s15, %s3520_s15 }
  0x32   : > { %p3523_p0 = pnand %p3521_p13, %p3459_p12  ;;  %p3530_p7 = por %p3529_p3, %p3528_p10 }
  0x34   : > { %p3524_p5 = pneg %p3523_p0 }
  0x36   : > { %p3531_p9 = pnand %p3530_p7, %p3524_p5 }
  0x38   : > { %3534 = shalt.err (!%p3531_p9)
}
  0x39   : > { %3323 = dma.hbm_to_vmem [thread:$0]  (!%p3739_p11), %s4860_s5, 1024, %s253_s11, [#allocation10], %s4863_s16, %s4863_s16, %s4865_s17  }
  0x3a   : > { %s29_s19 = ssub.s32 %s3635_s27, %s3765_s13  ;;  %s32_s12 = sadd.s32 1, %s3631_s26 }
  0x3b   : > { %p30_p12 = scmp.eq.s32.totalorder %s29_s19, 0  ;;  %p39_p13 = scmp.ne.s32.totalorder %s3631_s26, %s3627_s25 }
  0x3c   : > { %p40_p0 = scmp.eq.s32.totalorder %s3635_s27, 0  ;;  %p3335_p5 = scmp.lt.s32.totalorder %s3635_s27, 2 }
  0x3d   : > { %s3786_s20 = scalar_select %p30_p12, %s3631_s26, %s32_s12  }
  0x3e   : > { %p41_p10 = por %p40_p0, %p39_p13  ;;  %p3790_p3 = por %p195_p2, %p39_p13 }
  0x3f   : > { %s269_s22 = sand.u32 1, %s3631_s26   ;;  %s2788_s23 = sshll.u32 %s3635_s27, 11 }
  0x40   : > { %s4875_s21 = scalar_select %p3790_p3, 1, 0 }
  0x41   : > { %s2696_s29 = sshll.u32 %s269_s22, 7  ;;  %s3799_s11 = scalar_lea.hbm %s4855_s0, %s2788_s23 }
  0x42   : > { %s273_s14 = scalar_lea.vmem [#allocation3], %s2696_s29  ;;  %p3801_p11 = pnand %p3335_p5, %p41_p10 }
  0x43   : > { %s280_s18 = sshll.u32 %s273_s14, 4  ;;  %s3807_s12 = scalar_lea.sflag [#allocation4], %s269_s22  ;;  %s3805_s18 = int_to_ptr.vmem [resolvable:$true] %s280_s18 }
  0x44   : > { %s3535_s16 = scalar_lea.hbm %s3799_s11, 2048  ;;  %p3537_p7 = pneg %p3801_p11 }
  0x45   : > { %p3536_p2 = scmp.ne.s32.totalorder %s3799_s11, %s3535_s16  ;;  %s3540_s29 = scalar_lea.hbm %s4855_s0, 4096 }
  0x46   : > { %p3541_p13 = scmp.lt.s32.totalorder %s3799_s11, %s4855_s0  ;;  %p3542_p0 = scmp.lt.s32.totalorder %s3540_s29, %s3535_s16 }
  0x47   : > { %p3538_p9 = pnand %p3537_p7, %p3536_p2 }
  0x48   : > { %p3543_p5 = por %p3542_p0, %p3541_p13 }
  0x49   : > { %p3539_p12 = pneg %p3538_p9 }
  0x4b   : > { %p3544_p10 = pnand %p3543_p5, %p3539_p12 }
  0x4d   : > { %3547 = shalt.err (!%p3544_p10)
}
  0x4e   : > { %s3548_s22 = scalar_lea.vmem %s3805_s18, 2048  ;;  %s3644_s17 = smov [#allocation3]  }
  0x4f   : > { %p3549_p1 = scmp.ne.s32.totalorder %s3805_s18, %s3548_s22  ;;  %s3553_s1 = sshll.u32 %s3644_s17, 4  ;;  %s3554_s1 = int_to_ptr.vmem [resolvable:$false] %s3553_s1 }
  0x50   : > { %s3555_s23 = scalar_lea.vmem %s3554_s1, 4096  ;;  %p3556_p9 = scmp.lt.s32.totalorder %s3805_s18, %s3554_s1 }
  0x51   : > { %p3551_p6 = pnand %p3549_p1, %p3537_p7  ;;  %p3557_p3 = scmp.lt.s32.totalorder %s3555_s23, %s3548_s22 }
  0x53   : > { %p3552_p2 = pneg %p3551_p6  ;;  %p3558_p4 = por %p3557_p3, %p3556_p9 }
  0x55   : > { %p3559_p8 = pnand %p3558_p4, %p3552_p2 }
  0x57   : > { %3562 = shalt.err (!%p3559_p8)
}
  0x58   : > { %s4877_s16 = smov 4   ;;  %s4878_s10 = smov 64  }
  0x59   : > { %3327 = dma.hbm_to_vmem [thread:$0]  (!%p3801_p11), %s3799_s11, 2048, %s3805_s18, %s3807_s12, %s4878_s10, %s4878_s10, %s4877_s16  }
  0x5a   : > { %p4879_p1 = scmp.ne.s32.totalorder %s4872_s9, 0 }
  0x5b   : > { %s3834_s17 = sand.u32 (!%p4879_p1), 1, %s3627_s25   ;;  %p4880_p4 = scmp.ne.s32.totalorder (!%p4879_p1), %s4870_s30, 0 }
  0x5c   : > { %292 = sbr.rel (%p4879_p1) target bundleno = 783 (0x30f), region = 48  ;;  %s2700_s1 = sshll.u32 (!%p4879_p1), %s3834_s17, 7 }
  0x5d   : > { %s295_s29 = scalar_lea.sflag (!%p4879_p1), [#allocation4], %s3834_s17  ;;  %s3838_s15 = scalar_lea.vmem (!%p4879_p1), [#allocation3], %s2700_s1 }
  0x61   : > { %3606 = dma.done.wait (%p4880_p4), %s295_s29, 2048  }
  0x62   : > { %3608 = vsyncadd (%p4880_p4), %s295_s29, 4294965248  ;;  %p4881_p6 = scmp.eq.s32.totalorder %s3711_s28, 0 }
  0x64   : > { %3610 = dma.done.wait (%p4881_p6), [#allocation7], 1280   ;;  %p4882_p8 = pmov %p4881_p6 }
  0x65   : > { %p4883_p3 = pmov %p4881_p6 }
  0x66   : > { %3612 = vsyncadd (%p4882_p8), [#allocation7], 4294966016 }
  0x67   : > { %3614 = dma.done.wait (%p4883_p3), [#allocation10], 1024   ;;  %p4884_p11 = pmov %p4883_p3 }
  0x68   : > { %v3383_v0 = vld [vmem:[#allocation6 + $0x38] sm:$0xff]   ;;  %v3384_v1 = vld [vmem:[#allocation6 + $0x30] sm:$0xff]   ;;  %v3385_v2 = vld [vmem:[#allocation6 + $0x28] sm:$0xff]   ;;  %v3645_v24 = vmov 0   ;;  %v932_v33 = vlaneseq  ;;  %v3646_v41 = vmov 0.0   ;;  %s2704_s23 = sshll.u32 %s3834_s17, 8 }
  0x69   : > { %3616 = vsyncadd (%p4884_p11), [#allocation10], 4294966272  ;;  %3202 = vmatprep.subr.bf16.mxu0 %v3383_v0  ;;  %v3386_v3 = vld [vmem:[#allocation6 + $0x20] sm:$0xff]   ;;  %v3387_v5 = vld [vmem:[#allocation6 + $0x18] sm:$0xff]   ;;  %927 = vst [vmem:[#allocation2] sm:$0xf] %v3645_v24 }
  0x6a   : > { %3203 = vmatpush3.bf16.msra.mxu0 %v3383_v0  ;;  %v342_v4 = vld [vmem:[%s3838_s15] sm:$0xff]   ;;  %v3388_v6 = vld [vmem:[#allocation6 + $0x10] sm:$0xff]   ;;  %v3389_v7 = vld [vmem:[#allocation6 + $0x8] sm:$0xff]   ;;  %928 = vst [vmem:[#allocation2 + $0x4] sm:$0xf] %v3645_v24  ;;  %v3868_v35 = vshrl.u32 %v932_v33, 7 }
  0x6b   : > { %3204 = vmatprep.subr.bf16.mxu0 %v3384_v1  ;;  %3218 = vmatprep.mubr.bf16.mxu0 %v342_v4  ;;  %v3390_v8 = vld [vmem:[#allocation6] sm:$0xff]   ;;  %v344_v9 = vld [vmem:[%s3838_s15 + $0x8] sm:$0xff]   ;;  %v346_v10 = vld [vmem:[%s3838_s15 + $0x10] sm:$0xff]   ;;  %930 = vst [vmem:[#allocation2 + $0x88] sm:$0xf] %v3645_v24  ;;  %s4727_s16 = scalar_lea.vmem [#allocation11], %s2704_s23 }
  0x6c   : > { %v348_v11 = vld [vmem:[%s3838_s15 + $0x18] sm:$0xff]   ;;  %v350_v12 = vld [vmem:[%s3838_s15 + $0x20] sm:$0xff]   ;;  %v352_v13 = vld [vmem:[%s3838_s15 + $0x28] sm:$0xff]   ;;  %931 = vst [vmem:[#allocation2 + $0x8c] sm:$0xf] %v3645_v24  ;;  %v934_v38 = vadd.s32 8, %v3868_v35 }
  0x6d   : > { %v354_v14 = vld [vmem:[%s3838_s15 + $0x30] sm:$0xff]   ;;  %v356_v15 = vld [vmem:[%s3838_s15 + $0x38] sm:$0xff]   ;;  %v358_v16 = vld [vmem:[%s3838_s15 + $0x40] sm:$0xff]   ;;  %vm935_vm0 = vcmp.gt.s32.totalorder %v3868_v35, 0  ;;  %vm1094_vm2 = vcmp.lt.s32.totalorder %v3868_v35, 1  ;;  %vm1223_vm3 = vcmp.lt.s32.totalorder %v3868_v35, 7 }
  0x6e   : > { %3205 = vmatpush3.bf16.msra.mxu0 %v3384_v1  ;;  %v360_v17 = vld [vmem:[%s3838_s15 + $0x48] sm:$0xff]   ;;  %v362_v18 = vld [vmem:[%s3838_s15 + $0x50] sm:$0xff]   ;;  %v364_v19 = vld [vmem:[%s3838_s15 + $0x58] sm:$0xff]   ;;  %v2762_v42 = vsel %vm935_vm0, 1.0, %v3646_v41  ;;  %vm942_vm1 = vcmp.lt.s32.totalorder %v934_v38, 15  ;;  %s2821_s10 = sshll.u32 %s3711_s28, 12 }
  0x6f   : > { %3206 = vmatprep.subr.bf16.mxu0 %v3385_v2  ;;  %v366_v20 = vld [vmem:[%s3838_s15 + $0x60] sm:$0xff]   ;;  %v368_v21 = vld [vmem:[%s3838_s15 + $0x68] sm:$0xff]   ;;  %v370_v22 = vld [vmem:[%s3838_s15 + $0x70] sm:$0xff]   ;;  %v2763_v53 = vsel %vm942_vm1, 1.0, %v3646_v41  ;;  %s2588_s1 = sshll.u32 %s4727_s16, 4  ;;  %s4808_s30 = scalar_lea.hbm %s4862_s7, %s2821_s10  ;;  %s4810_s1 = int_to_ptr.vmem [resolvable:$true] %s2588_s1 }
  0x70   : > { %v372_v23 = vld [vmem:[%s3838_s15 + $0x78] sm:$0xff]   ;;  %v3407_v25 = vld [vmem:[#allocation9 + $0x38] sm:$0xff]   ;;  %v3408_v26 = vld [vmem:[#allocation9 + $0x30] sm:$0xff]   ;;  %s2575_s28 = scalar_lea.sflag [#allocation5], %s3834_s17  ;;  %s3563_s9 = scalar_lea.vmem %s4810_s1, 4096 }
  0x71   : > { %3250 = vmatprep.subr.bf16.mxu1 %v3407_v25  ;;  %v3409_v27 = vld [vmem:[#allocation9 + $0x28] sm:$0xff]   ;;  %v3410_v28 = vld [vmem:[#allocation9 + $0x20] sm:$0xff]   ;;  %v3411_v29 = vld [vmem:[#allocation9 + $0x18] sm:$0xff]   ;;  %p3564_p7 = scmp.ne.s32.totalorder %s4810_s1, %s3563_s9  ;;  %p4885_p12 = scmp.ne.s32.totalorder %s4875_s21, 0 }
  0x72   : > { %3207 = vmatpush3.bf16.msra.mxu0 %v3385_v2  ;;  %3251 = vmatpush3.bf16.msra.mxu1 %v3407_v25  ;;  %v3412_v30 = vld [vmem:[#allocation9 + $0x10] sm:$0xff]   ;;  %v3413_v31 = vld [vmem:[#allocation9 + $0x8] sm:$0xff]   ;;  %v3414_v32 = vld [vmem:[#allocation9] sm:$0xff]   ;;  %s3647_s11 = smov [#allocation11]  }
  0x73   : > { %3208 = vmatprep.subr.bf16.mxu0 %v3386_v3  ;;  %3252 = vmatprep.subr.bf16.mxu1 %v3408_v26  ;;  %v2903_v34 = vld [vmem:[#allocation2] sm:$0xff]   ;;  %v3872_v43 = vld [vmem:[#allocation8] ss:$0 sm:$0xff]  ;;  %v3888_v54 = vld [vmem:[#allocation8 + $0x1] ss:$0 sm:$0xff]  ;;  %p3565_p13 = pnand %p3564_p7, %p4885_p12  ;;  %s3567_s18 = sshll.u32 %s3647_s11, 4  ;;  %s3568_s18 = int_to_ptr.vmem [resolvable:$false] %s3567_s18 }
  0x74   : > { %v2904_v36 = vunpack.c.l.bf16 %v2903_v34  ;;  %v2905_v37 = vunpack.c.h.bf16 %v2903_v34  ;;  %v3877_v45 = vld [vmem:[%s4857_s2] ss:$0 sm:$0xff]  ;;  %v3885_v51 = vmul.f32 %v3872_v43, %v2762_v42  ;;  %v3890_v55 = vld [vmem:[#allocation8 + $0x2] ss:$0 sm:$0xff]  ;;  %s3569_s19 = scalar_lea.vmem %s3568_s18, 8192  ;;  %p3570_p5 = scmp.lt.s32.totalorder %s4810_s1, %s3568_s18 }
  0x75   : > { %v3904_v2 = vmul.f32 %v3890_v55, %v2763_v53  ;;  %p3566_p0 = pneg %p3565_p13  ;;  %p3571_p10 = scmp.lt.s32.totalorder %s3569_s19, %s3563_s9 }
  0x76   : > { %3209 = vmatpush3.bf16.msra.mxu0 %v3386_v3  ;;  %3253 = vmatpush3.bf16.msra.mxu1 %v3408_v26  ;;  %v1062_v39 = vrot.slane %v2904_v36, 7  ;;  %v1078_v40 = vrot.slane %v2905_v37, 7  ;;  %v1191_v48 = vrot.slane %v2904_v36, 1  ;;  %v1207_v49 = vrot.slane %v2905_v37, 1  ;;  %v3930_v26 = vld [vmem:[#allocation8 + $0x7] ss:$0 sm:$0xff] }
  0x77   : > { %3210 = vmatprep.subr.bf16.mxu0 %v3387_v5  ;;  %3254 = vmatprep.subr.bf16.mxu1 %v3409_v27  ;;  %v1030_v57 = vmul.f32 %v2904_v36, %v3888_v54  ;;  %v1031_v58 = vmul.f32 %v2905_v37, %v3888_v54  ;;  %p3572_p2 = por %p3571_p10, %p3570_p5 }
  0x78   : > { %v1095_v46 = vsel %vm1094_vm2, %v1062_v39, %v1078_v40  ;;  %v1111_v47 = vsel %vm1094_vm2, %v1078_v40, %v1062_v39  ;;  %v1224_v63 = vsel %vm1223_vm3, %v1191_v48, %v1207_v49  ;;  %v1240_v0 = vsel %vm1223_vm3, %v1207_v49, %v1191_v48  ;;  %v3946_v39 = vld [vmem:[#allocation8 + $0x4] ss:$0 sm:$0xff] }
  0x79   : > { %v1127_v59 = vmul.f32 %v1111_v47, %v3885_v51  ;;  %v1128_v60 = vmul.f32 %v3872_v43, %v1095_v46  ;;  %p3573_p9 = pnand %p3572_p2, %p3566_p0 }
  0x7a   : > { %3211 = vmatpush3.bf16.msra.mxu0 %v3387_v5  ;;  %3255 = vmatpush3.bf16.msra.mxu1 %v3409_v27 }
  0x7b   : > { %3212 = vmatprep.subr.bf16.mxu0 %v3388_v6  ;;  %3256 = vmatprep.subr.bf16.mxu1 %v3410_v28 }
  0x7e   : > { %3213 = vmatpush3.bf16.msra.mxu0 %v3388_v6  ;;  %3257 = vmatpush3.bf16.msra.mxu1 %v3410_v28  ;;  %v3907_v6 = vld [vmem:[#allocation8 + $0x3] ss:$0 sm:$0xff] }
  0x7f   : > { %3214 = vmatprep.subr.bf16.mxu0 %v3389_v7  ;;  %3258 = vmatprep.subr.bf16.mxu1 %v3411_v29 }
  0x82   : > { %3215 = vmatpush3.bf16.msra.mxu0 %v3389_v7  ;;  %3259 = vmatpush3.bf16.msra.mxu1 %v3411_v29  ;;  %v3909_v7 = vld [vmem:[#allocation8 + $0x5] ss:$0 sm:$0xff] }
  0x83   : > { %3216 = vmatprep.subr.bf16.mxu0 %v3390_v8  ;;  %3260 = vmatprep.subr.bf16.mxu1 %v3412_v30 }
  0x86   : > { %3217 = vmatpush3.bf16.msra.mxu0 %v3390_v8  ;;  %3261 = vmatpush3.bf16.msra.mxu1 %v3412_v30 }
  0x87   : > { %3262 = vmatprep.subr.bf16.mxu1 %v3413_v31 }
  0x89   : > { %3219 = vmatmul.mubr.bf16.vlgmr.msra.gmra.mxu0 %v344_v9  ;;  %v1159_v9 = vadd.f32 %v1127_v59, %v1030_v57 }
  0x8a   : > { %3222 = vmatprep.mubr.bf16.mxu0 %v346_v10  ;;  %3263 = vmatpush3.bf16.msra.mxu1 %v3413_v31  ;;  %v1160_v10 = vadd.f32 %v1128_v60, %v1031_v58 }
  0x8b   : > { %3264 = vmatprep.subr.bf16.mxu1 %v3414_v32 }
  0x8e   : > { %3265 = vmatpush3.bf16.msra.mxu1 %v3414_v32 }
  0x91   : > { %3223 = vmatmul.mubr.bf16.gmra.mxu0 %v348_v11  ;;  %v1256_v11 = vmul.f32 %v3890_v55, %v1224_v63 }
  0x92   : > { %3226 = vmatprep.mubr.bf16.mxu0 %v350_v12  ;;  %v1257_v12 = vmul.f32 %v1240_v0, %v3904_v2 }
  0x93   : > { %v3932_v28 = vadd.f32 %v1256_v11, %v1159_v9 }
  0x94   : > { %v3934_v29 = vadd.f32 %v1257_v12, %v1160_v10 }
  0x99   : > { %3227 = vmatmul.mubr.bf16.gmra.mxu0 %v352_v13  ;;  %v3913_v13 = vld [vmem:[#allocation8 + $0x6] ss:$0 sm:$0xff] }
  0x9a   : > { %3230 = vmatprep.mubr.bf16.mxu0 %v354_v14  ;;  %v3928_v25 = vmul.f32 %v3913_v13, %v2762_v42 }
  0xa1   : > { %3231 = vmatmul.mubr.bf16.gmra.mxu0 %v356_v15 }
  0xa2   : > { %3234 = vmatprep.mubr.bf16.mxu0 %v358_v16 }
  0xa9   : > { %3235 = vmatmul.mubr.bf16.gmra.mxu0 %v360_v17 }
  0xaa   : > { %3238 = vmatprep.mubr.bf16.mxu0 %v362_v18  ;;  %v3916_v18 = vld [vmem:[#allocation8 + $0x8] ss:$0 sm:$0xff] }
  0xab   : > { %v3939_v31 = vmul.f32 %v3916_v18, %v2763_v53 }
  0xb1   : > { %3239 = vmatmul.mubr.bf16.gmra.mxu0 %v364_v19 }
  0xb2   : > { %3242 = vmatprep.mubr.bf16.mxu0 %v366_v20  ;;  %v3919_v20 = vmul.f32 %v3907_v6, %v2762_v42 }
  0xb9   : > { %3243 = vmatmul.mubr.bf16.gmra.mxu0 %v368_v21  ;;  %v3922_v21 = vmul.f32 %v3909_v7, %v2763_v53 }
  0xba   : > { %3246 = vmatprep.mubr.bf16.mxu0 %v370_v22 }
  0xc1   : > { %3247 = vmatmul.mubr.bf16.gmra.mxu0 %v372_v23 }
 0x149   : > { %v3220_v44 = vpop.f32.mrf.mxu0 }
 0x14a   : > { %v704_v52 = vadd.f32 %v3220_v44, %v3877_v45 }
 0x14b   : > { %v568_v50 = vpop.f32.mrf.mxu0 }
 0x14c   : > { %v702_v61 = vadd.f32 %v3877_v45, %v568_v50  ;;  %v736_v3 = vmax.f32 %v704_v52, 0.0 }
 0x14d   : > { %v3221_v56 = vpop.f32.mrf.mxu0 }
 0x14e   : > { %v705_v62 = vadd.f32 %v3221_v56, %v3877_v45  ;;  %v734_v14 = vmax.f32 %v702_v61, 0.0 }
 0x14f   : > { %v571_v1 = vpop.f32.mrf.mxu0 }
 0x150   : > { %v737_v4 = vmax.f32 %v705_v62, 0.0  ;;  %v703_v5 = vadd.f32 %v3877_v45, %v571_v1 }
 0x151   : > { %v3224_v8 = vpop.f32.mrf.mxu0 }
 0x152   : > { %v2830_v15 = vpack.c.bf16 %v737_v4, %v736_v3  ;;  %v735_v16 = vmax.f32 %v703_v5, 0.0  ;;  %v708_v17 = vadd.f32 %v3224_v8, %v3877_v45 }
 0x153   : > { %v584_v19 = vpop.f32.mrf.mxu0 }
 0x154   : > { %v2825_v22 = vpack.c.bf16 %v735_v16, %v734_v14  ;;  %v706_v23 = vadd.f32 %v3877_v45, %v584_v19  ;;  %v3925_v24 = vunpack.c.l.bf16 %v2830_v15  ;;  %v3936_v30 = vunpack.c.h.bf16 %v2830_v15 }
 0x155   : > { %v3225_v27 = vpop.f32.mrf.mxu0  ;;  %v740_v32 = vmax.f32 %v708_v17, 0.0 }
 0x156   : > { %v709_v33 = vadd.f32 %v3225_v27, %v3877_v45  ;;  %v3942_v34 = vunpack.c.l.bf16 %v2825_v22  ;;  %v3944_v36 = vunpack.c.h.bf16 %v2825_v22  ;;  %v738_v37 = vmax.f32 %v706_v23, 0.0 }
 0x157   : > { %v587_v38 = vpop.f32.mrf.mxu0  ;;  %v1807_v40 = vmul.f32 %v3925_v24, %v3930_v26  ;;  %v1808_v41 = vmul.f32 %v3936_v30, %v3930_v26  ;;  %v1839_v42 = vrot.slane %v3925_v24, 7  ;;  %v1855_v48 = vrot.slane %v3936_v30, 7 }
 0x158   : > { %v741_v44 = vmax.f32 %v709_v33, 0.0  ;;  %v707_v46 = vadd.f32 %v3877_v45, %v587_v38  ;;  %v1403_v47 = vmul.f32 %v3942_v34, %v3946_v39  ;;  %v1435_v50 = vrot.slane %v3942_v34, 7 }
 0x159   : > { %v3228_v49 = vpop.f32.mrf.mxu0  ;;  %v1451_v52 = vrot.slane %v3944_v36, 7  ;;  %v1563_v53 = vrot.slane %v3942_v34, 1  ;;  %v1579_v56 = vrot.slane %v3944_v36, 1  ;;  %v1404_v60 = vmul.f32 %v3944_v36, %v3946_v39 }
 0x15a   : > { %v3961_v57 = vpack.c.bf16 %v741_v44, %v740_v32  ;;  %v739_v58 = vmax.f32 %v707_v46, 0.0  ;;  %v712_v59 = vadd.f32 %v3228_v49, %v3877_v45  ;;  %v3979_v8 = vsel %vm1094_vm2, %v1839_v42, %v1855_v48 }
 0x15b   : > { %v600_v61 = vpop.f32.mrf.mxu0  ;;  %v1467_v62 = vsel %vm1094_vm2, %v1435_v50, %v1451_v52  ;;  %v1483_v63 = vsel %vm1094_vm2, %v1451_v52, %v1435_v50  ;;  %v1595_v0 = vsel %vm1223_vm3, %v1563_v53, %v1579_v56  ;;  %v1611_v1 = vsel %vm1223_vm3, %v1579_v56, %v1563_v53 }
 0x15c   : > { %v3974_v3 = vpack.c.bf16 %v739_v58, %v738_v37  ;;  %v744_v4 = vmax.f32 %v712_v59, 0.0  ;;  %v1499_v5 = vmul.f32 %v1483_v63, %v3919_v20  ;;  %v710_v9 = vadd.f32 %v3877_v45, %v600_v61 }
 0x15d   : > { %v3229_v10 = vpop.f32.mrf.mxu0  ;;  %v1500_v11 = vmul.f32 %v3907_v6, %v1467_v62  ;;  %v1627_v12 = vmul.f32 %v3909_v7, %v1595_v0  ;;  %v3986_v14 = vsel %vm1094_vm2, %v1855_v48, %v1839_v42  ;;  %v1628_v17 = vmul.f32 %v1611_v1, %v3922_v21 }
 0x15e   : > { %v713_v15 = vadd.f32 %v3229_v10, %v3877_v45  ;;  %v1531_v16 = vadd.f32 %v1499_v5, %v1403_v47  ;;  %v1903_v19 = vmul.f32 %v3986_v14, %v3928_v25  ;;  %v1904_v27 = vmul.f32 %v3913_v13, %v3979_v8 }
 0x15f   : > { %v603_v22 = vpop.f32.mrf.mxu0  ;;  %v1532_v23 = vadd.f32 %v1500_v11, %v1404_v60  ;;  %v1967_v32 = vrot.slane %v3925_v24, 1  ;;  %v1983_v33 = vrot.slane %v3936_v30, 1  ;;  %v742_v52 = vmax.f32 %v710_v9, 0.0 }
 0x160   : > { %v745_v37 = vmax.f32 %v713_v15, 0.0  ;;  %v711_v38 = vadd.f32 %v3877_v45, %v603_v22  ;;  %v1659_v42 = vadd.f32 %v1627_v12, %v1531_v16  ;;  %v1935_v44 = vadd.f32 %v1903_v19, %v1807_v40  ;;  %v4028_v22 = vld [vmem:[%s4859_s4] ss:$0 sm:$0xff] }
 0x161   : > { %v3232_v46 = vpop.f32.mrf.mxu0  ;;  %v1660_v47 = vadd.f32 %v1628_v17, %v1532_v23  ;;  %v1936_v48 = vadd.f32 %v1904_v27, %v1808_v41  ;;  %v3999_v49 = vsel %vm1223_vm3, %v1967_v32, %v1983_v33  ;;  %v4003_v50 = vsel %vm1223_vm3, %v1983_v33, %v1967_v32 }
 0x162   : > { %v4005_v53 = vpack.c.bf16 %v745_v37, %v744_v4  ;;  %v743_v56 = vmax.f32 %v711_v38, 0.0  ;;  %v716_v58 = vadd.f32 %v3232_v46, %v3877_v45  ;;  %v1691_v40 = vadd.f32 %v1659_v42, %v3932_v28 }
 0x163   : > { %v616_v59 = vpop.f32.mrf.mxu0  ;;  %v1692_v60 = vadd.f32 %v1660_v47, %v3934_v29  ;;  %v2031_v41 = vmul.f32 %v3916_v18, %v3999_v49  ;;  %v2032_v61 = vmul.f32 %v4003_v50, %v3939_v31  ;;  %v1032_v9 = vmul.f32 %v3942_v34, %v3888_v54 }
 0x164   : > { %3098 = vst [vmem:[#allocation2 + $0x30] sm:$0xff] %v4005_v53   ;;  %v4015_v5 = vpack.c.bf16 %v743_v56, %v742_v52  ;;  %v714_v4 = vadd.f32 %v3877_v45, %v616_v59  ;;  %v1033_v28 = vmul.f32 %v3944_v36, %v3888_v54  ;;  %v1129_v12 = vmul.f32 %v1483_v63, %v3885_v51 }
 0x165   : > { %v3233_v10 = vpop.f32.mrf.mxu0  ;;  %v2063_v29 = vadd.f32 %v2031_v41, %v1935_v44  ;;  %v2064_v11 = vadd.f32 %v2032_v61, %v1936_v48  ;;  %v1130_v15 = vmul.f32 %v3872_v43, %v1467_v62  ;;  %v748_v16 = vmax.f32 %v716_v58, 0.0 }
 0x166   : > { %v746_v17 = vmax.f32 %v714_v4, 0.0  ;;  %v717_v19 = vadd.f32 %v3233_v10, %v3877_v45  ;;  %v1258_v34 = vmul.f32 %v3890_v55, %v1595_v0  ;;  %v1161_v32 = vadd.f32 %v1129_v12, %v1032_v9 }
 0x167   : > { %v619_v23 = vpop.f32.mrf.mxu0  ;;  %v2095_v36 = vadd.f32 %v2063_v29, %v1691_v40  ;;  %v2096_v27 = vadd.f32 %v2064_v11, %v1692_v60  ;;  %v1162_v33 = vadd.f32 %v1130_v15, %v1033_v28  ;;  %v1259_v62 = vmul.f32 %v1611_v1, %v3904_v2 }
 0x168   : > { %v749_v37 = vmax.f32 %v717_v19, 0.0  ;;  %v715_v63 = vadd.f32 %v3877_v45, %v619_v23  ;;  %v1405_v38 = vmul.f32 %v3925_v24, %v3946_v39  ;;  %v1290_v47 = vadd.f32 %v1258_v34, %v1161_v32 }
 0x169   : > { %v3236_v42 = vpop.f32.mrf.mxu0  ;;  %v2134_v44 = vadd.f32 %v4028_v22, %v2095_v36  ;;  %v2135_v46 = vadd.f32 %v4028_v22, %v2096_v27  ;;  %v1406_v0 = vmul.f32 %v3936_v30, %v3946_v39  ;;  %v1501_v58 = vmul.f32 %v3986_v14, %v3919_v20 }
 0x16a   : > { %v2860_v48 = vpack.c.bf16 %v749_v37, %v748_v16  ;;  %v747_v52 = vmax.f32 %v715_v63, 0.0  ;;  %v720_v56 = vadd.f32 %v3236_v42, %v3877_v45  ;;  %v1291_v60 = vadd.f32 %v1259_v62, %v1162_v33 }
 0x16b   : > { %v632_v1 = vpop.f32.mrf.mxu0  ;;  %v2166_v59 = vmax.f32 %v2134_v44, 0.0  ;;  %v2167_v40 = vmax.f32 %v2135_v46, 0.0  ;;  %v1502_v41 = vmul.f32 %v3907_v6, %v3979_v8  ;;  %v1533_v9 = vadd.f32 %v1501_v58, %v1405_v38 }
 0x16c   : > { %3100 = vst [vmem:[#allocation2 + $0x40] sm:$0xff] %v2860_v48   ;;  %v2855_v61 = vpack.c.bf16 %v747_v52, %v746_v17  ;;  %v718_v4 = vadd.f32 %v3877_v45, %v632_v1  ;;  %v1629_v28 = vmul.f32 %v3909_v7, %v3999_v49  ;;  %v1630_v12 = vmul.f32 %v4003_v50, %v3922_v21 }
 0x16d   : > { %v3237_v10 = vpop.f32.mrf.mxu0  ;;  %v2198_v29 = vpack.c.bf16 %v2167_v40, %v2166_v59  ;;  %v1534_v11 = vadd.f32 %v1502_v41, %v1406_v0  ;;  %v4050_v15 = vunpack.c.l.bf16 %v3974_v3  ;;  %v752_v16 = vmax.f32 %v720_v56, 0.0 }
 0x16e   : > { %3099 = vst [vmem:[#allocation2 + $0x38] sm:$0xff] %v2855_v61   ;;  %v721_v19 = vadd.f32 %v3237_v10, %v3877_v45  ;;  %v1661_v17 = vadd.f32 %v1629_v28, %v1533_v9  ;;  %v4054_v34 = vunpack.c.h.bf16 %v3974_v3  ;;  %v750_v23 = vmax.f32 %v718_v4, 0.0 }
 0x16f   : > { %v635_v36 = vpop.f32.mrf.mxu0  ;;  %3266 = vmatprep.mubr.bf16.mxu1 %v2198_v29  ;;  %v1662_v27 = vadd.f32 %v1630_v12, %v1534_v11  ;;  %v1840_v32 = vrot.slane %v4050_v15, 7  ;;  %v1968_v33 = vrot.slane %v4050_v15, 1  ;;  %v1809_v38 = vmul.f32 %v4050_v15, %v3930_v26 }
 0x170   : > { %v753_v37 = vmax.f32 %v721_v19, 0.0  ;;  %v719_v63 = vadd.f32 %v3877_v45, %v635_v36  ;;  %v1693_v62 = vadd.f32 %v1661_v17, %v1290_v47  ;;  %v1810_v3 = vmul.f32 %v4054_v34, %v3930_v26 }
 0x171   : > { %v3240_v42 = vpop.f32.mrf.mxu0  ;;  %v1694_v44 = vadd.f32 %v1662_v27, %v1291_v60  ;;  %v1856_v46 = vrot.slane %v4054_v34, 7  ;;  %v1984_v0 = vrot.slane %v4054_v34, 1  ;;  %v1034_v58 = vmul.f32 %v3925_v24, %v3888_v54 }
 0x172   : > { %v2870_v48 = vpack.c.bf16 %v753_v37, %v752_v16  ;;  %v751_v52 = vmax.f32 %v719_v63, 0.0  ;;  %v724_v56 = vadd.f32 %v3240_v42, %v3877_v45  ;;  %v1035_v4 = vmul.f32 %v3936_v30, %v3888_v54 }
 0x173   : > { %v648_v47 = vpop.f32.mrf.mxu0  ;;  %v4070_v1 = vsel %vm1094_vm2, %v1840_v32, %v1856_v46  ;;  %v4074_v59 = vsel %vm1094_vm2, %v1856_v46, %v1840_v32  ;;  %v4078_v40 = vsel %vm1223_vm3, %v1968_v33, %v1984_v0  ;;  %v4082_v60 = vsel %vm1223_vm3, %v1984_v0, %v1968_v33 }
 0x174   : > { %3102 = vst [vmem:[#allocation2 + $0x50] sm:$0xff] %v2870_v48   ;;  %v2865_v41 = vpack.c.bf16 %v751_v52, %v750_v23  ;;  %v722_v24 = vadd.f32 %v3877_v45, %v648_v47  ;;  %v1905_v61 = vmul.f32 %v4074_v59, %v3928_v25  ;;  %v756_v9 = vmax.f32 %v724_v56, 0.0 }
 0x175   : > { %v3241_v28 = vpop.f32.mrf.mxu0  ;;  %v1906_v10 = vmul.f32 %v3913_v13, %v4070_v1  ;;  %v2033_v29 = vmul.f32 %v3916_v18, %v4078_v40  ;;  %v1131_v11 = vmul.f32 %v3986_v14, %v3885_v51  ;;  %v2034_v19 = vmul.f32 %v4082_v60, %v3939_v31 }
 0x176   : > { %3101 = vst [vmem:[#allocation2 + $0x48] sm:$0xff] %v2865_v41   ;;  %v725_v12 = vadd.f32 %v3241_v28, %v3877_v45  ;;  %v1937_v16 = vadd.f32 %v1905_v61, %v1809_v38  ;;  %v1132_v30 = vmul.f32 %v3872_v43, %v3979_v8  ;;  %v754_v17 = vmax.f32 %v722_v24, 0.0 }
 0x177   : > { %v651_v23 = vpop.f32.mrf.mxu0  ;;  %v1938_v36 = vadd.f32 %v1906_v10, %v1810_v3  ;;  %v1163_v27 = vadd.f32 %v1131_v11, %v1034_v58  ;;  %v1260_v32 = vmul.f32 %v3890_v55, %v3999_v49  ;;  %v1261_v46 = vmul.f32 %v4003_v50, %v3904_v2 }
 0x178   : > { %v757_v33 = vmax.f32 %v725_v12, 0.0  ;;  %v723_v14 = vadd.f32 %v3877_v45, %v651_v23  ;;  %v2065_v37 = vadd.f32 %v2033_v29, %v1937_v16  ;;  %v1164_v63 = vadd.f32 %v1132_v30, %v1035_v4 }
 0x179   : > { %v3244_v42 = vpop.f32.mrf.mxu0  ;;  %v2066_v38 = vadd.f32 %v2034_v19, %v1938_v36  ;;  %v1292_v0 = vadd.f32 %v1260_v32, %v1163_v27  ;;  %v1407_v8 = vmul.f32 %v4050_v15, %v3946_v39  ;;  %v1408_v47 = vmul.f32 %v4054_v34, %v3946_v39 }
 0x17a   : > { %v2880_v48 = vpack.c.bf16 %v757_v33, %v756_v9  ;;  %v755_v3 = vmax.f32 %v723_v14, 0.0  ;;  %v728_v52 = vadd.f32 %v3244_v42, %v3877_v45  ;;  %v2097_v56 = vadd.f32 %v2065_v37, %v1693_v62 }
 0x17b   : > { %v2098_v49 = vadd.f32 %v2066_v38, %v1694_v44  ;;  %v664_v58 = vpop.f32.mrf.mxu0  ;;  %v1503_v41 = vmul.f32 %v4074_v59, %v3919_v20  ;;  %v1504_v50 = vmul.f32 %v3907_v6, %v4070_v1  ;;  %v1293_v9 = vadd.f32 %v1261_v46, %v1164_v63 }
 0x17c   : > { %3104 = vst [vmem:[#allocation2 + $0x60] sm:$0xff] %v2880_v48   ;;  %v2875_v24 = vpack.c.bf16 %v755_v3, %v754_v17  ;;  %v2136_v61 = vadd.f32 %v4028_v22, %v2097_v56  ;;  %v726_v4 = vadd.f32 %v3877_v45, %v664_v58  ;;  %v1631_v10 = vmul.f32 %v3909_v7, %v4078_v40 }
 0x17d   : > { %v2137_v62 = vadd.f32 %v4028_v22, %v2098_v49  ;;  %v1535_v44 = vadd.f32 %v1503_v41, %v1407_v8  ;;  %v1536_v28 = vadd.f32 %v1504_v50, %v1408_v47  ;;  %v3245_v29 = vpop.f32.mrf.mxu0  ;;  %v760_v11 = vmax.f32 %v728_v52, 0.0 }
 0x17e   : > { %3103 = vst [vmem:[#allocation2 + $0x58] sm:$0xff] %v2875_v24   ;;  %v2168_v12 = vmax.f32 %v2136_v61, 0.0  ;;  %v1632_v16 = vmul.f32 %v4082_v60, %v3922_v21  ;;  %v4122_v19 = vunpack.c.l.bf16 %v3961_v57  ;;  %v4125_v23 = vunpack.c.h.bf16 %v3961_v57 }
 0x17f   : > { %v2169_v30 = vmax.f32 %v2137_v62, 0.0  ;;  %v1663_v17 = vadd.f32 %v1631_v10, %v1535_v44  ;;  %v729_v36 = vadd.f32 %v3245_v29, %v3877_v45  ;;  %v667_v27 = vpop.f32.mrf.mxu0  ;;  %v758_v32 = vmax.f32 %v726_v4, 0.0 }
 0x180   : > { %v1664_v33 = vadd.f32 %v1632_v16, %v1536_v28  ;;  %v1841_v14 = vrot.slane %v4122_v19, 7  ;;  %v1969_v37 = vrot.slane %v4122_v19, 1  ;;  %v1811_v38 = vmul.f32 %v4122_v19, %v3930_v26 }
 0x181   : > { %v2199_v63 = vpack.c.bf16 %v2169_v30, %v2168_v12  ;;  %v1695_v42 = vadd.f32 %v1663_v17, %v1292_v0  ;;  %v1857_v46 = vrot.slane %v4125_v23, 7  ;;  %v3248_v8 = vpop.f32.mrf.mxu0  ;;  %v1812_v57 = vmul.f32 %v4125_v23, %v3930_v26 }
 0x182   : > { %v1985_v48 = vrot.slane %v4125_v23, 1  ;;  %v761_v3 = vmax.f32 %v729_v36, 0.0  ;;  %v727_v52 = vadd.f32 %v3877_v45, %v667_v27  ;;  %v1696_v56 = vadd.f32 %v1664_v33, %v1293_v9 }
 0x183   : > { %3267 = vmatmul.mubr.bf16.vlgmr.msra.gmra.mxu1 %v2199_v63  ;;  %v4139_v49 = vsel %vm1094_vm2, %v1841_v14, %v1857_v46  ;;  %v4143_v0 = vsel %vm1094_vm2, %v1857_v46, %v1841_v14  ;;  %v4146_v58 = vadd.f32 %v3248_v8, %v3877_v45  ;;  %v1036_v62 = vmul.f32 %v4050_v15, %v3888_v54  ;;  %v680_v63 = vpop.f32.mrf.mxu0 }
 0x184   : > { %v1907_v47 = vmul.f32 %v4143_v0, %v3928_v25  ;;  %v1908_v41 = vmul.f32 %v3913_v13, %v4139_v49  ;;  %v4154_v50 = vsel %vm1223_vm3, %v1969_v37, %v1985_v48  ;;  %v4158_v24 = vsel %vm1223_vm3, %v1985_v48, %v1969_v37 }
 0x185   : > { %v2035_v61 = vmul.f32 %v3916_v18, %v4154_v50  ;;  %v2890_v4 = vpack.c.bf16 %v761_v3, %v760_v11  ;;  %v759_v9 = vmax.f32 %v727_v52, 0.0  ;;  %v2036_v10 = vmul.f32 %v4158_v24, %v3939_v31 }
 0x186   : > { %v1939_v44 = vadd.f32 %v1907_v47, %v1811_v38  ;;  %v1940_v28 = vadd.f32 %v1908_v41, %v1812_v57  ;;  %v764_v29 = vmax.f32 %v4146_v58, 0.0  ;;  %v1037_v16 = vmul.f32 %v4054_v34, %v3888_v54 }
 0x187   : > { %3106 = vst [vmem:[#allocation2 + $0x70] sm:$0xff] %v2890_v4   ;;  %v2885_v12 = vpack.c.bf16 %v759_v9, %v758_v32  ;;  %v1133_v30 = vmul.f32 %v4074_v59, %v3885_v51  ;;  %v1134_v11 = vmul.f32 %v3872_v43, %v4070_v1  ;;  %v1262_v36 = vmul.f32 %v3890_v55, %v4078_v40 }
 0x188   : > { %v2067_v17 = vadd.f32 %v2035_v61, %v1939_v44  ;;  %v2068_v15 = vadd.f32 %v2036_v10, %v1940_v28  ;;  %v1263_v27 = vmul.f32 %v4082_v60, %v3904_v2  ;;  %v1409_v34 = vmul.f32 %v4122_v19, %v3946_v39 }
 0x189   : > { %3105 = vst [vmem:[#allocation2 + $0x68] sm:$0xff] %v2885_v12   ;;  %v1165_v33 = vadd.f32 %v1133_v30, %v1036_v62  ;;  %v1166_v32 = vadd.f32 %v1134_v11, %v1037_v16  ;;  %v1505_v59 = vmul.f32 %v4143_v0, %v3919_v20  ;;  %v1410_v1 = vmul.f32 %v4125_v23, %v3946_v39 }
 0x18a   : > { %v2099_v14 = vadd.f32 %v2067_v17, %v1695_v42  ;;  %v2100_v37 = vadd.f32 %v2068_v15, %v1696_v56  ;;  %v1506_v40 = vmul.f32 %v3907_v6, %v4139_v49  ;;  %v1633_v46 = vmul.f32 %v3909_v7, %v4154_v50 }
 0x18b   : > { %v1294_v38 = vadd.f32 %v1262_v36, %v1165_v33  ;;  %v1537_v60 = vadd.f32 %v1505_v59, %v1409_v34  ;;  %v1634_v8 = vmul.f32 %v4158_v24, %v3922_v21  ;;  %v4192_v3 = vunpack.c.l.bf16 %v4015_v5 }
 0x18c   : > { %v2138_v57 = vadd.f32 %v4028_v22, %v2099_v14  ;;  %v2139_v42 = vadd.f32 %v4028_v22, %v2100_v37  ;;  %v1538_v48 = vadd.f32 %v1506_v40, %v1410_v1  ;;  %v1295_v52 = vadd.f32 %v1263_v27, %v1166_v32  ;;  %v3249_v1 = vpop.f32.mrf.mxu0 }
 0x18d   : > { %v1665_v56 = vadd.f32 %v1633_v46, %v1537_v60  ;;  %v4195_v47 = vunpack.c.h.bf16 %v4015_v5  ;;  %v4198_v41 = vadd.f32 %v3877_v45, %v680_v63  ;;  %v1038_v62 = vmul.f32 %v4122_v19, %v3888_v54 }
 0x18e   : > { %v2170_v61 = vmax.f32 %v2138_v57, 0.0  ;;  %v2171_v4 = vmax.f32 %v2139_v42, 0.0  ;;  %v1666_v9 = vadd.f32 %v1634_v8, %v1538_v48  ;;  %v1813_v28 = vmul.f32 %v4192_v3, %v3930_v26 }
 0x18f   : > { %v1697_v44 = vadd.f32 %v1665_v56, %v1294_v38  ;;  %v1842_v10 = vrot.slane %v4192_v3, 7  ;;  %v1858_v12 = vrot.slane %v4195_v47, 7  ;;  %v1814_v5 = vmul.f32 %v4195_v47, %v3930_v26 }
 0x190   : > { %v2200_v16 = vpack.c.bf16 %v2171_v4, %v2170_v61  ;;  %v1970_v30 = vrot.slane %v4192_v3, 1  ;;  %v1986_v11 = vrot.slane %v4195_v47, 1  ;;  %v1698_v17 = vadd.f32 %v1666_v9, %v1295_v52  ;;  %v683_v4 = vpop.f32.mrf.mxu0 }
 0x191   : > { %v4212_v19 = vsel %vm1094_vm2, %v1842_v10, %v1858_v12  ;;  %v4216_v15 = vsel %vm1094_vm2, %v1858_v12, %v1842_v10  ;;  %v1039_v36 = vmul.f32 %v4125_v23, %v3888_v54  ;;  %v1135_v14 = vmul.f32 %v4143_v0, %v3885_v51 }
 0x192   : > { %3270 = vmatprep.mubr.bf16.mxu1 %v2200_v16  ;;  %v1909_v27 = vmul.f32 %v4216_v15, %v3928_v25  ;;  %v1910_v33 = vmul.f32 %v3913_v13, %v4212_v19  ;;  %v4226_v32 = vsel %vm1223_vm3, %v1970_v30, %v1986_v11  ;;  %v4230_v34 = vsel %vm1223_vm3, %v1986_v11, %v1970_v30 }
 0x193   : > { %v2037_v59 = vmul.f32 %v3916_v18, %v4226_v32  ;;  %v2038_v23 = vmul.f32 %v4230_v34, %v3939_v31  ;;  %v1136_v37 = vmul.f32 %v3872_v43, %v4139_v49  ;;  %v1264_v38 = vmul.f32 %v3890_v55, %v4154_v50 }
 0x194   : > { %v1941_v40 = vadd.f32 %v1909_v27, %v1813_v28  ;;  %v1942_v63 = vadd.f32 %v1910_v33, %v1814_v5  ;;  %v1265_v60 = vmul.f32 %v4158_v24, %v3904_v2  ;;  %v1167_v46 = vadd.f32 %v1135_v14, %v1038_v62 }
 0x195   : > { %v1168_v8 = vadd.f32 %v1136_v37, %v1039_v36  ;;  %v1411_v57 = vmul.f32 %v4192_v3, %v3946_v39  ;;  %v1412_v0 = vmul.f32 %v4195_v47, %v3946_v39  ;;  %v1507_v49 = vmul.f32 %v4216_v15, %v3919_v20 }
 0x196   : > { %v2069_v42 = vadd.f32 %v2037_v59, %v1941_v40  ;;  %v2070_v48 = vadd.f32 %v2038_v23, %v1942_v63  ;;  %v1508_v52 = vmul.f32 %v3907_v6, %v4212_v19  ;;  %v762_v50 = vmax.f32 %v4198_v41, 0.0 }
 0x197   : > { %v1296_v56 = vadd.f32 %v1264_v38, %v1167_v46  ;;  %v1297_v24 = vadd.f32 %v1265_v60, %v1168_v8  ;;  %v1635_v61 = vmul.f32 %v3909_v7, %v4226_v32  ;;  %v1539_v28 = vadd.f32 %v1507_v49, %v1411_v57 }
 0x198   : > { %v2101_v9 = vadd.f32 %v2069_v42, %v1697_v44  ;;  %v2102_v62 = vadd.f32 %v2070_v48, %v1698_v17  ;;  %v1540_v10 = vadd.f32 %v1508_v52, %v1412_v0  ;;  %v1636_v12 = vmul.f32 %v4230_v34, %v3922_v21 }
 0x199   : > { %v3048_v16 = vunpack.c.l.bf16 %v4005_v53  ;;  %v3049_v5 = vunpack.c.h.bf16 %v4005_v53  ;;  %v733_v30 = vadd.f32 %v3249_v1, %v3877_v45  ;;  %v1667_v36 = vadd.f32 %v1635_v61, %v1539_v28 }
 0x19a   : > { %v2140_v41 = vadd.f32 %v4028_v22, %v2101_v9  ;;  %v2141_v11 = vadd.f32 %v4028_v22, %v2102_v62  ;;  %v731_v27 = vadd.f32 %v3877_v45, %v683_v4  ;;  %v1668_v44 = vadd.f32 %v1636_v12, %v1540_v10  ;;  %v3128_v4 = vld [vmem:[#allocation2 + $0x30] sm:$0xff]  }
 0x19b   : > { %v1815_v17 = vmul.f32 %v3048_v16, %v3930_v26  ;;  %v1843_v33 = vrot.slane %v3048_v16, 7  ;;  %v1859_v59 = vrot.slane %v3049_v5, 7  ;;  %v1699_v37 = vadd.f32 %v1667_v36, %v1296_v56 }
 0x19c   : > { %v2172_v23 = vmax.f32 %v2140_v41, 0.0  ;;  %v2173_v14 = vmax.f32 %v2141_v11, 0.0  ;;  %v1816_v40 = vmul.f32 %v3049_v5, %v3930_v26  ;;  %v1971_v63 = vrot.slane %v3048_v16, 1 }
 0x19d   : > { %v1875_v53 = vsel %vm1094_vm2, %v1843_v33, %v1859_v59  ;;  %v1891_v1 = vsel %vm1094_vm2, %v1859_v59, %v1843_v33  ;;  %v1987_v38 = vrot.slane %v3049_v5, 1  ;;  %v765_v8 = vmax.f32 %v733_v30, 0.0  ;;  %v3143_v30 = vld [vmem:[#allocation2 + $0x38] sm:$0xff]  }
 0x19e   : > { %v2201_v60 = vpack.c.bf16 %v2173_v14, %v2172_v23  ;;  %v1911_v45 = vmul.f32 %v1891_v1, %v3928_v25  ;;  %v1912_v46 = vmul.f32 %v3913_v13, %v1875_v53  ;;  %v1700_v57 = vadd.f32 %v1668_v44, %v1297_v24 }
 0x19f   : > { %v2003_v0 = vsel %vm1223_vm3, %v1971_v63, %v1987_v38  ;;  %v2019_v42 = vsel %vm1223_vm3, %v1987_v38, %v1971_v63  ;;  %v763_v48 = vmax.f32 %v731_v27, 0.0  ;;  %v2900_v9 = vpack.c.bf16 %v765_v8, %v764_v29 }
 0x1a0   : > { %3271 = vmatmul.mubr.bf16.gmra.mxu1 %v2201_v60  ;;  %v1943_v49 = vadd.f32 %v1911_v45, %v1815_v17  ;;  %v1944_v52 = vadd.f32 %v1912_v46, %v1816_v40  ;;  %v2039_v56 = vmul.f32 %v3916_v18, %v2003_v0  ;;  %v2040_v61 = vmul.f32 %v2019_v42, %v3939_v31 }
 0x1a1   : > { %v2895_v62 = vpack.c.bf16 %v763_v48, %v762_v50  ;;  %v1040_v24 = vmul.f32 %v4192_v3, %v3888_v54  ;;  %v1137_v28 = vmul.f32 %v4216_v15, %v3885_v51  ;;  %v1041_v16 = vmul.f32 %v4195_v47, %v3888_v54  ;;  %3108 = vst [vmem:[#allocation2 + $0x80] sm:$0xff] %v2900_v9  }
 0x1a2   : > { %v2071_v10 = vadd.f32 %v2039_v56, %v1943_v49  ;;  %v2072_v12 = vadd.f32 %v2040_v61, %v1944_v52  ;;  %v1138_v5 = vmul.f32 %v3872_v43, %v4212_v19  ;;  %v1266_v29 = vmul.f32 %v3890_v55, %v4226_v32 }
 0x1a3   : > { %3107 = vst [vmem:[#allocation2 + $0x78] sm:$0xff] %v2895_v62   ;;  %v1169_v58 = vadd.f32 %v1137_v28, %v1040_v24  ;;  %v2988_v50 = vunpack.c.l.bf16 %v3128_v4  ;;  %v2989_v3 = vunpack.c.h.bf16 %v3128_v4  ;;  %v1267_v36 = vmul.f32 %v4230_v34, %v3904_v2 }
 0x1a4   : > { %v2103_v41 = vadd.f32 %v2071_v10, %v1699_v37  ;;  %v2104_v11 = vadd.f32 %v2072_v12, %v1700_v57  ;;  %v1170_v15 = vadd.f32 %v1138_v5, %v1041_v16  ;;  %v4292_v19 = vunpack.c.l.bf16 %v3143_v30 }
 0x1a5   : > { %v1298_v27 = vadd.f32 %v1266_v29, %v1169_v58  ;;  %v1413_v47 = vmul.f32 %v2988_v50, %v3946_v39  ;;  %v1440_v44 = vrot.slane %v2988_v50, 7  ;;  %v1414_v32 = vmul.f32 %v2989_v3, %v3946_v39 }
 0x1a6   : > { %v2142_v17 = vadd.f32 %v4028_v22, %v2103_v41  ;;  %v2143_v33 = vadd.f32 %v4028_v22, %v2104_v11  ;;  %v1456_v59 = vrot.slane %v2989_v3, 7  ;;  %v1299_v23 = vadd.f32 %v1267_v36, %v1170_v15 }
 0x1a7   : > { %v1568_v14 = vrot.slane %v2988_v50, 1  ;;  %v1584_v37 = vrot.slane %v2989_v3, 1  ;;  %v4297_v40 = vunpack.c.h.bf16 %v3143_v30  ;;  %v1817_v42 = vmul.f32 %v4292_v19, %v3930_v26 }
 0x1a8   : > { %v2174_v53 = vmax.f32 %v2142_v17, 0.0  ;;  %v2175_v34 = vmax.f32 %v2143_v33, 0.0  ;;  %v1472_v1 = vsel %vm1094_vm2, %v1440_v44, %v1456_v59  ;;  %v1488_v63 = vsel %vm1094_vm2, %v1456_v59, %v1440_v44 }
 0x1a9   : > { %v1509_v38 = vmul.f32 %v1488_v63, %v3919_v20  ;;  %v1510_v60 = vmul.f32 %v3907_v6, %v1472_v1  ;;  %v1600_v45 = vsel %vm1223_vm3, %v1568_v14, %v1584_v37  ;;  %v1616_v46 = vsel %vm1223_vm3, %v1584_v37, %v1568_v14 }
 0x1aa   : > { %v2202_v8 = vpack.c.bf16 %v2175_v34, %v2174_v53  ;;  %v1637_v57 = vmul.f32 %v3909_v7, %v1600_v45  ;;  %v1638_v0 = vmul.f32 %v1616_v46, %v3922_v21  ;;  %v1844_v52 = vrot.slane %v4292_v19, 7  ;;  %v3144_v34 = vld [vmem:[#allocation2 + $0x40] sm:$0xff]  }
 0x1ab   : > { %v1541_v48 = vadd.f32 %v1509_v38, %v1413_v47  ;;  %v1542_v49 = vadd.f32 %v1510_v60, %v1414_v32  ;;  %v1860_v56 = vrot.slane %v4297_v40, 7  ;;  %v1818_v61 = vmul.f32 %v4297_v40, %v3930_v26 }
 0x1ac   : > { %3274 = vmatprep.mubr.bf16.mxu1 %v2202_v8  ;;  %v1972_v4 = vrot.slane %v4292_v19, 1  ;;  %v1988_v9 = vrot.slane %v4297_v40, 1  ;;  %v1042_v62 = vmul.f32 %v2988_v50, %v3888_v54  ;;  %v1043_v11 = vmul.f32 %v2989_v3, %v3888_v54 }
 0x1ad   : > { %v1669_v24 = vadd.f32 %v1637_v57, %v1541_v48  ;;  %v1670_v28 = vadd.f32 %v1638_v0, %v1542_v49  ;;  %v4322_v10 = vsel %vm1094_vm2, %v1844_v52, %v1860_v56  ;;  %v1892_v12 = vsel %vm1094_vm2, %v1860_v56, %v1844_v52 }
 0x1ae   : > { %v1913_v16 = vmul.f32 %v1892_v12, %v3928_v25  ;;  %v1914_v5 = vmul.f32 %v3913_v13, %v4322_v10  ;;  %v4331_v30 = vsel %vm1223_vm3, %v1972_v4, %v1988_v9  ;;  %v4335_v58 = vsel %vm1223_vm3, %v1988_v9, %v1972_v4 }
 0x1af   : > { %v1701_v29 = vadd.f32 %v1669_v24, %v1298_v27  ;;  %v2041_v50 = vmul.f32 %v3916_v18, %v4331_v30  ;;  %v2042_v41 = vmul.f32 %v4335_v58, %v3939_v31  ;;  %v1139_v47 = vmul.f32 %v1488_v63, %v3885_v51 }
 0x1b0   : > { %v1945_v15 = vadd.f32 %v1913_v16, %v1817_v42  ;;  %v1946_v36 = vadd.f32 %v1914_v5, %v1818_v61  ;;  %v1140_v44 = vmul.f32 %v3872_v43, %v1472_v1  ;;  %v1702_v17 = vadd.f32 %v1670_v28, %v1299_v23 }
 0x1b1   : > { %v1268_v33 = vmul.f32 %v3890_v55, %v1600_v45  ;;  %v1269_v32 = vmul.f32 %v1616_v46, %v3904_v2  ;;  %v1415_v27 = vmul.f32 %v4292_v19, %v3946_v39  ;;  %v1171_v37 = vadd.f32 %v1139_v47, %v1042_v62 }
 0x1b2   : > { %v2073_v59 = vadd.f32 %v2041_v50, %v1945_v15  ;;  %v2074_v14 = vadd.f32 %v2042_v41, %v1946_v36  ;;  %v1172_v53 = vadd.f32 %v1140_v44, %v1043_v11  ;;  %v1416_v3 = vmul.f32 %v4297_v40, %v3946_v39 }
 0x1b3   : > { %v1511_v63 = vmul.f32 %v1892_v12, %v3919_v20  ;;  %v1512_v43 = vmul.f32 %v3907_v6, %v4322_v10  ;;  %v1639_v23 = vmul.f32 %v3909_v7, %v4331_v30  ;;  %v1300_v60 = vadd.f32 %v1268_v33, %v1171_v37 }
 0x1b4   : > { %v2105_v1 = vadd.f32 %v2073_v59, %v1701_v29  ;;  %v2106_v38 = vadd.f32 %v2074_v14, %v1702_v17  ;;  %v1640_v45 = vmul.f32 %v4335_v58, %v3922_v21  ;;  %v3056_v57 = vunpack.c.l.bf16 %v3144_v34 }
 0x1b5   : > { %v1543_v46 = vadd.f32 %v1511_v63, %v1415_v27  ;;  %v1544_v8 = vadd.f32 %v1512_v43, %v1416_v3  ;;  %v3057_v0 = vunpack.c.h.bf16 %v3144_v34  ;;  %v1301_v49 = vadd.f32 %v1269_v32, %v1172_v53  ;;  %v4379_v32 = vld [vmem:[#allocation8] ss:$0 sm:$0xff]  ;;  %v3145_v63 = vld [vmem:[#allocation2 + $0x48] sm:$0xff]  }
 0x1b6   : > { %v2144_v42 = vadd.f32 %v4028_v22, %v2105_v1  ;;  %v2145_v48 = vadd.f32 %v4028_v22, %v2106_v38  ;;  %v1044_v52 = vmul.f32 %v4292_v19, %v3888_v54  ;;  %v1819_v4 = vmul.f32 %v3056_v57, %v3930_v26 }
 0x1b7   : > { %v1671_v56 = vadd.f32 %v1639_v23, %v1543_v46  ;;  %v1672_v61 = vadd.f32 %v1640_v45, %v1544_v8  ;;  %v1045_v9 = vmul.f32 %v4297_v40, %v3888_v54  ;;  %v1845_v28 = vrot.slane %v3056_v57, 7 }
 0x1b8   : > { %v2176_v62 = vmax.f32 %v2144_v42, 0.0  ;;  %v2177_v24 = vmax.f32 %v2145_v48, 0.0  ;;  %v1861_v16 = vrot.slane %v3057_v0, 7  ;;  %v1820_v29 = vmul.f32 %v3057_v0, %v3930_v26 }
 0x1b9   : > { %v1703_v5 = vadd.f32 %v1671_v56, %v1300_v60  ;;  %v1973_v50 = vrot.slane %v3056_v57, 1  ;;  %v1989_v41 = vrot.slane %v3057_v0, 1  ;;  %v1141_v36 = vmul.f32 %v1892_v12, %v3885_v51 }
 0x1ba   : > { %v2203_v11 = vpack.c.bf16 %v2177_v24, %v2176_v62  ;;  %v1877_v19 = vsel %vm1094_vm2, %v1845_v28, %v1861_v16  ;;  %v1893_v15 = vsel %vm1094_vm2, %v1861_v16, %v1845_v28  ;;  %v1704_v17 = vadd.f32 %v1672_v61, %v1301_v49 }
 0x1bb   : > { %v1915_v54 = vmul.f32 %v1893_v15, %v3928_v25  ;;  %v1916_v40 = vmul.f32 %v3913_v13, %v1877_v19  ;;  %v2005_v47 = vsel %vm1223_vm3, %v1973_v50, %v1989_v41  ;;  %v4376_v44 = vsel %vm1223_vm3, %v1989_v41, %v1973_v50 }
 0x1bc   : > { %3275 = vmatmul.mubr.bf16.gmra.mxu1 %v2203_v11  ;;  %v2043_v33 = vmul.f32 %v3916_v18, %v2005_v47  ;;  %v1142_v12 = vmul.f32 %v4379_v32, %v4322_v10  ;;  %v1173_v27 = vadd.f32 %v1141_v36, %v1044_v52  ;;  %v2044_v13 = vmul.f32 %v4376_v44, %v3939_v31  ;;  %v4396_v52 = vld [vmem:[#allocation8 + $0x1] ss:$0 sm:$0xff] }
 0x1bd   : > { %v1947_v59 = vadd.f32 %v1915_v54, %v1819_v4  ;;  %v1948_v14 = vadd.f32 %v1916_v40, %v1820_v29  ;;  %v1270_v37 = vmul.f32 %v3890_v55, %v4331_v30  ;;  %v1271_v34 = vmul.f32 %v4335_v58, %v3904_v2  ;;  %v4415_v54 = vld [vmem:[#allocation8 + $0x6] ss:$0 sm:$0xff] }
 0x1be   : > { %v1174_v53 = vadd.f32 %v1142_v12, %v1045_v9  ;;  %v1417_v18 = vmul.f32 %v3056_v57, %v3946_v39  ;;  %v1513_v3 = vmul.f32 %v1893_v15, %v3919_v20  ;;  %v1418_v23 = vmul.f32 %v3057_v0, %v3946_v39  ;;  %v4428_v12 = vld [vmem:[#allocation8 + $0x2] ss:$0 sm:$0xff] }
 0x1bf   : > { %v2075_v43 = vadd.f32 %v2043_v33, %v1947_v59  ;;  %v2076_v10 = vadd.f32 %v2044_v13, %v1948_v14  ;;  %v1514_v1 = vmul.f32 %v3907_v6, %v1877_v19  ;;  %v1302_v38 = vadd.f32 %v1270_v37, %v1173_v27  ;;  %v4431_v13 = vld [vmem:[#allocation8 + $0x8] ss:$0 sm:$0xff] }
 0x1c0   : > { %v1545_v60 = vadd.f32 %v1513_v3, %v1417_v18  ;;  %v1641_v45 = vmul.f32 %v3909_v7, %v2005_v47  ;;  %v1642_v55 = vmul.f32 %v4376_v44, %v3922_v21  ;;  %v3060_v8 = vunpack.c.l.bf16 %v3145_v63 }
 0x1c1   : > { %v2107_v30 = vadd.f32 %v2075_v43, %v1703_v5  ;;  %v2108_v58 = vadd.f32 %v2076_v10, %v1704_v17  ;;  %v1546_v46 = vadd.f32 %v1514_v1, %v1418_v23  ;;  %v1303_v42 = vadd.f32 %v1271_v34, %v1174_v53  ;;  %v4439_v10 = vld [vmem:[#allocation8 + $0x4] ss:$0 sm:$0xff] }
 0x1c2   : > { %v1673_v48 = vadd.f32 %v1641_v45, %v1545_v60  ;;  %v3061_v49 = vunpack.c.h.bf16 %v3145_v63  ;;  %v1046_v39 = vmul.f32 %v4396_v52, %v3056_v57  ;;  %v1047_v7 = vmul.f32 %v4396_v52, %v3057_v0  ;;  %v3146_v63 = vld [vmem:[#allocation2 + $0x50] sm:$0xff]  }
 0x1c3   : > { %v2146_v6 = vadd.f32 %v4028_v22, %v2107_v30  ;;  %v2147_v56 = vadd.f32 %v4028_v22, %v2108_v58  ;;  %v1674_v61 = vadd.f32 %v1642_v55, %v1546_v46  ;;  %v1821_v9 = vmul.f32 %v3060_v8, %v3930_v26  ;;  %v4445_v45 = vld [vmem:[#allocation8 + $0x3] ss:$0 sm:$0xff] }
 0x1c4   : > { %v1705_v4 = vadd.f32 %v1673_v48, %v1302_v38  ;;  %v1846_v62 = vrot.slane %v3060_v8, 7  ;;  %v1862_v24 = vrot.slane %v3061_v49, 7  ;;  %v1822_v5 = vmul.f32 %v3061_v49, %v3930_v26 }
 0x1c5   : > { %v2178_v28 = vmax.f32 %v2146_v6, 0.0  ;;  %v2179_v16 = vmax.f32 %v2147_v56, 0.0  ;;  %v1974_v29 = vrot.slane %v3060_v8, 1  ;;  %v1990_v41 = vrot.slane %v3061_v49, 1 }
 0x1c6   : > { %v4406_v57 = vsel %vm1094_vm2, %v1846_v62, %v1862_v24  ;;  %v4410_v50 = vsel %vm1094_vm2, %v1862_v24, %v1846_v62  ;;  %v1143_v0 = vmul.f32 %v1893_v15, %v3885_v51  ;;  %v1144_v40 = vmul.f32 %v4379_v32, %v1877_v19 }
 0x1c7   : > { %v2204_v11 = vpack.c.bf16 %v2179_v16, %v2178_v28  ;;  %v1917_v36 = vmul.f32 %v4410_v50, %v3928_v25  ;;  %v1918_v26 = vmul.f32 %v4415_v54, %v4406_v57  ;;  %v4422_v17 = vsel %vm1223_vm3, %v1974_v29, %v1990_v41  ;;  %v4459_v16 = vld [vmem:[#allocation8 + $0x7] ss:$0 sm:$0xff] }
 0x1c8   : > { %v4426_v33 = vsel %vm1223_vm3, %v1990_v41, %v1974_v29  ;;  %v1175_v15 = vadd.f32 %v1143_v0, %v1046_v39  ;;  %v1272_v27 = vmul.f32 %v4428_v12, %v2005_v47  ;;  %v2045_v19 = vmul.f32 %v4431_v13, %v4422_v17 }
 0x1c9   : > { %3278 = vmatprep.mubr.bf16.mxu1 %v2204_v11  ;;  %v1949_v59 = vadd.f32 %v1917_v36, %v1821_v9  ;;  %v1950_v14 = vadd.f32 %v1918_v26, %v1822_v5  ;;  %v2046_v37 = vmul.f32 %v4426_v33, %v3939_v31  ;;  %v1706_v53 = vadd.f32 %v1674_v61, %v1303_v42 }
 0x1ca   : > { %v1176_v34 = vadd.f32 %v1144_v40, %v1047_v7  ;;  %v1273_v18 = vmul.f32 %v4376_v44, %v3904_v2  ;;  %v1304_v3 = vadd.f32 %v1272_v27, %v1175_v15  ;;  %v1419_v23 = vmul.f32 %v4439_v10, %v3060_v8  ;;  %v4449_v44 = vld [vmem:[#allocation8 + $0x5] ss:$0 sm:$0xff] }
 0x1cb   : > { %v2077_v43 = vadd.f32 %v2045_v19, %v1949_v59  ;;  %v2078_v47 = vadd.f32 %v2046_v37, %v1950_v14  ;;  %v1515_v1 = vmul.f32 %v4410_v50, %v3919_v20  ;;  %v1420_v60 = vmul.f32 %v4439_v10, %v3061_v49 }
 0x1cc   : > { %v1305_v38 = vadd.f32 %v1273_v18, %v1176_v34  ;;  %v1516_v55 = vmul.f32 %v4445_v45, %v4406_v57  ;;  %v1643_v30 = vmul.f32 %v4449_v44, %v4422_v17  ;;  %v3064_v48 = vunpack.c.l.bf16 %v3146_v63 }
 0x1cd   : > { %v2109_v58 = vadd.f32 %v2077_v43, %v1705_v4  ;;  %v2110_v46 = vadd.f32 %v2078_v47, %v1706_v53  ;;  %v1547_v42 = vadd.f32 %v1515_v1, %v1419_v23  ;;  %v1644_v6 = vmul.f32 %v4426_v33, %v3922_v21 }
 0x1ce   : > { %v1548_v39 = vadd.f32 %v1516_v55, %v1420_v60  ;;  %v3065_v56 = vunpack.c.h.bf16 %v3146_v63  ;;  %v1048_v61 = vmul.f32 %v4396_v52, %v3060_v8  ;;  %v1049_v24 = vmul.f32 %v4396_v52, %v3061_v49 }
 0x1cf   : > { %v2148_v7 = vadd.f32 %v4028_v22, %v2109_v58  ;;  %v2149_v9 = vadd.f32 %v4028_v22, %v2110_v46  ;;  %v1675_v62 = vadd.f32 %v1643_v30, %v1547_v42  ;;  %v1823_v4 = vmul.f32 %v4459_v16, %v3064_v48  ;;  %v3147_v30 = vld [vmem:[#allocation2 + $0x58] sm:$0xff]  }
 0x1d0   : > { %v1676_v28 = vadd.f32 %v1644_v6, %v1548_v39  ;;  %v1847_v5 = vrot.slane %v3064_v48, 7  ;;  %v1863_v29 = vrot.slane %v3065_v56, 7  ;;  %v1824_v11 = vmul.f32 %v4459_v16, %v3065_v56 }
 0x1d1   : > { %v2180_v41 = vmax.f32 %v2148_v7, 0.0  ;;  %v2181_v0 = vmax.f32 %v2149_v9, 0.0  ;;  %v1975_v36 = vrot.slane %v3064_v48, 1  ;;  %v1707_v8 = vadd.f32 %v1675_v62, %v1304_v3 }
 0x1d2   : > { %v1879_v26 = vsel %vm1094_vm2, %v1847_v5, %v1863_v29  ;;  %v1895_v40 = vsel %vm1094_vm2, %v1863_v29, %v1847_v5  ;;  %v1991_v49 = vrot.slane %v3065_v56, 1  ;;  %v1145_v14 = vmul.f32 %v4410_v50, %v3885_v51 }
 0x1d3   : > { %v2205_v15 = vpack.c.bf16 %v2181_v0, %v2180_v41  ;;  %v1919_v27 = vmul.f32 %v1895_v40, %v3928_v25  ;;  %v1920_v59 = vmul.f32 %v4415_v54, %v1879_v26  ;;  %v1708_v19 = vadd.f32 %v1676_v28, %v1305_v38 }
 0x1d4   : > { %v2007_v37 = vsel %vm1223_vm3, %v1975_v36, %v1991_v49  ;;  %v4475_v53 = vsel %vm1223_vm3, %v1991_v49, %v1975_v36  ;;  %v1146_v34 = vmul.f32 %v4379_v32, %v4406_v57  ;;  %v1177_v50 = vadd.f32 %v1145_v14, %v1048_v61 }
 0x1d5   : > { %3279 = vmatmul.mubr.bf16.gmra.mxu1 %v2205_v15  ;;  %v1951_v18 = vadd.f32 %v1919_v27, %v1823_v4  ;;  %v1952_v3 = vadd.f32 %v1920_v59, %v1824_v11  ;;  %v2047_v63 = vmul.f32 %v4431_v13, %v2007_v37  ;;  %v2048_v43 = vmul.f32 %v4475_v53, %v3939_v31 }
 0x1d6   : > { %v1178_v47 = vadd.f32 %v1146_v34, %v1049_v24  ;;  %v1274_v23 = vmul.f32 %v4428_v12, %v4422_v17  ;;  %v1275_v1 = vmul.f32 %v4426_v33, %v3904_v2  ;;  %v1421_v57 = vmul.f32 %v4439_v10, %v3064_v48 }
 0x1d7   : > { %v2079_v38 = vadd.f32 %v2047_v63, %v1951_v18  ;;  %v2080_v60 = vadd.f32 %v2048_v43, %v1952_v3  ;;  %v1517_v55 = vmul.f32 %v1895_v40, %v3919_v20  ;;  %v1422_v42 = vmul.f32 %v4439_v10, %v3065_v56 }
 0x1d8   : > { %v1306_v58 = vadd.f32 %v1274_v23, %v1177_v50  ;;  %v1307_v46 = vadd.f32 %v1275_v1, %v1178_v47  ;;  %v1518_v39 = vmul.f32 %v4445_v45, %v1879_v26  ;;  %v1645_v17 = vmul.f32 %v4449_v44, %v2007_v37 }
 0x1d9   : > { %v2111_v6 = vadd.f32 %v2079_v38, %v1707_v8  ;;  %v2112_v61 = vadd.f32 %v2080_v60, %v1708_v19  ;;  %v1549_v7 = vadd.f32 %v1517_v55, %v1421_v57  ;;  %v1646_v33 = vmul.f32 %v4475_v53, %v3922_v21 }
 0x1da   : > { %v1550_v9 = vadd.f32 %v1518_v39, %v1422_v42  ;;  %v3068_v62 = vunpack.c.l.bf16 %v3147_v30  ;;  %v3069_v24 = vunpack.c.h.bf16 %v3147_v30  ;;  %v1050_v29 = vmul.f32 %v4396_v52, %v3064_v48  ;;  %v3148_v39 = vld [vmem:[#allocation2 + $0x60] sm:$0xff]  }
 0x1db   : > { %v2150_v28 = vadd.f32 %v4028_v22, %v2111_v6  ;;  %v2151_v4 = vadd.f32 %v4028_v22, %v2112_v61  ;;  %v1677_v5 = vadd.f32 %v1645_v17, %v1549_v7  ;;  %v1051_v36 = vmul.f32 %v4396_v52, %v3065_v56 }
 0x1dc   : > { %v1678_v41 = vadd.f32 %v1646_v33, %v1550_v9  ;;  %v1825_v0 = vmul.f32 %v4459_v16, %v3068_v62  ;;  %v1848_v11 = vrot.slane %v3068_v62, 7  ;;  %v1826_v15 = vmul.f32 %v4459_v16, %v3069_v24 }
 0x1dd   : > { %v2182_v8 = vmax.f32 %v2150_v28, 0.0  ;;  %v2183_v49 = vmax.f32 %v2151_v4, 0.0  ;;  %v1864_v27 = vrot.slane %v3069_v24, 7  ;;  %v1709_v59 = vadd.f32 %v1677_v5, %v1306_v58 }
 0x1de   : > { %v1976_v14 = vrot.slane %v3068_v62, 1  ;;  %v1992_v19 = vrot.slane %v3069_v24, 1  ;;  %v1147_v34 = vmul.f32 %v1895_v40, %v3885_v51  ;;  %v1148_v3 = vmul.f32 %v4379_v32, %v1879_v26 }
 0x1df   : > { %v2206_v22 = vpack.c.bf16 %v2183_v49, %v2182_v8  ;;  %v1880_v48 = vsel %vm1094_vm2, %v1848_v11, %v1864_v27  ;;  %v1896_v18 = vsel %vm1094_vm2, %v1864_v27, %v1848_v11  ;;  %v1710_v40 = vadd.f32 %v1678_v41, %v1307_v46 }
 0x1e0   : > { %v1921_v56 = vmul.f32 %v1896_v18, %v3928_v25  ;;  %v1922_v63 = vmul.f32 %v4415_v54, %v1880_v48  ;;  %v2008_v43 = vsel %vm1223_vm3, %v1976_v14, %v1992_v19  ;;  %v2024_v50 = vsel %vm1223_vm3, %v1992_v19, %v1976_v14 }
 0x1e1   : > { %3282 = vmatprep.mubr.bf16.mxu1 %v2206_v22  ;;  %v2049_v47 = vmul.f32 %v4431_v13, %v2008_v43  ;;  %v2050_v23 = vmul.f32 %v2024_v50, %v3939_v31  ;;  %v1179_v1 = vadd.f32 %v1147_v34, %v1050_v29  ;;  %v1180_v26 = vadd.f32 %v1148_v3, %v1051_v36 }
 0x1e2   : > { %v1953_v38 = vadd.f32 %v1921_v56, %v1825_v0  ;;  %v1954_v60 = vadd.f32 %v1922_v63, %v1826_v15  ;;  %v1276_v57 = vmul.f32 %v4428_v12, %v2007_v37  ;;  %v1423_v55 = vmul.f32 %v4439_v10, %v3068_v62 }
 0x1e3   : > { %v1424_v30 = vmul.f32 %v4439_v10, %v3069_v24  ;;  %v1519_v58 = vmul.f32 %v1896_v18, %v3919_v20  ;;  %v1520_v42 = vmul.f32 %v4445_v45, %v1880_v48  ;;  %v1277_v61 = vmul.f32 %v4475_v53, %v3904_v2  ;;  %v4526_v53 = vld [vmem:[%s4859_s4] ss:$0 sm:$0xff] }
 0x1e4   : > { %v2081_v46 = vadd.f32 %v2049_v47, %v1953_v38  ;;  %v2082_v6 = vadd.f32 %v2050_v23, %v1954_v60  ;;  %v1308_v7 = vadd.f32 %v1276_v57, %v1179_v1  ;;  %v1647_v33 = vmul.f32 %v4449_v44, %v2008_v43 }
 0x1e5   : > { %v1551_v17 = vadd.f32 %v1519_v58, %v1423_v55  ;;  %v1552_v9 = vadd.f32 %v1520_v42, %v1424_v30  ;;  %v1648_v37 = vmul.f32 %v2024_v50, %v3922_v21  ;;  %v3072_v5 = vunpack.c.l.bf16 %v3148_v39 }
 0x1e6   : > { %v2113_v28 = vadd.f32 %v2081_v46, %v1709_v59  ;;  %v2114_v4 = vadd.f32 %v2082_v6, %v1710_v40  ;;  %v3073_v29 = vunpack.c.h.bf16 %v3148_v39  ;;  %v1309_v41 = vadd.f32 %v1277_v61, %v1180_v26 }
 0x1e7   : > { %v1679_v0 = vadd.f32 %v1647_v33, %v1551_v17  ;;  %v1680_v11 = vadd.f32 %v1648_v37, %v1552_v9  ;;  %v1052_v36 = vmul.f32 %v4396_v52, %v3068_v62  ;;  %v1827_v15 = vmul.f32 %v4459_v16, %v3072_v5 }
 0x1e8   : > { %v2152_v8 = vadd.f32 %v4526_v53, %v2113_v28  ;;  %v2153_v49 = vadd.f32 %v4526_v53, %v2114_v4  ;;  %v1053_v27 = vmul.f32 %v4396_v52, %v3069_v24  ;;  %v1828_v14 = vmul.f32 %v4459_v16, %v3073_v29 }
 0x1e9   : > { %v1711_v59 = vadd.f32 %v1679_v0, %v1308_v7  ;;  %v1849_v19 = vrot.slane %v3072_v5, 7  ;;  %v1865_v34 = vrot.slane %v3073_v29, 7  ;;  %v1977_v3 = vrot.slane %v3072_v5, 1  ;;  %v3149_v7 = vld [vmem:[#allocation2 + $0x68] sm:$0xff]  }
 0x1ea   : > { %v2184_v22 = vmax.f32 %v2152_v8, 0.0  ;;  %v2185_v62 = vmax.f32 %v2153_v49, 0.0  ;;  %v1993_v56 = vrot.slane %v3073_v29, 1  ;;  %v1149_v47 = vmul.f32 %v1896_v18, %v3885_v51 }
 0x1eb   : > { %v1881_v63 = vsel %vm1094_vm2, %v1849_v19, %v1865_v34  ;;  %v1897_v40 = vsel %vm1094_vm2, %v1865_v34, %v1849_v19  ;;  %v1150_v23 = vmul.f32 %v4379_v32, %v1880_v48  ;;  %v1712_v26 = vadd.f32 %v1680_v11, %v1309_v41 }
 0x1ec   : > { %v2207_v24 = vpack.c.bf16 %v2185_v62, %v2184_v22  ;;  %v1923_v1 = vmul.f32 %v1897_v40, %v3928_v25  ;;  %v1924_v38 = vmul.f32 %v4415_v54, %v1881_v63  ;;  %v2009_v60 = vsel %vm1223_vm3, %v1977_v3, %v1993_v56 }
 0x1ed   : > { %v2025_v57 = vsel %vm1223_vm3, %v1993_v56, %v1977_v3  ;;  %v2051_v55 = vmul.f32 %v4431_v13, %v2009_v60  ;;  %v1181_v30 = vadd.f32 %v1149_v47, %v1052_v36  ;;  %v1182_v42 = vadd.f32 %v1150_v23, %v1053_v27 }
 0x1ee   : > { %3283 = vmatmul.mubr.bf16.gmra.mxu1 %v2207_v24  ;;  %v1955_v58 = vadd.f32 %v1923_v1, %v1827_v15  ;;  %v1956_v18 = vadd.f32 %v1924_v38, %v1828_v14  ;;  %v2052_v48 = vmul.f32 %v2025_v57, %v3939_v31  ;;  %v1278_v39 = vmul.f32 %v4428_v12, %v2008_v43 }
 0x1ef   : > { %v1279_v46 = vmul.f32 %v2024_v50, %v3904_v2  ;;  %v1425_v6 = vmul.f32 %v4439_v10, %v3072_v5  ;;  %v1521_v61 = vmul.f32 %v1897_v40, %v3919_v20  ;;  %v1426_v33 = vmul.f32 %v4439_v10, %v3073_v29 }
 0x1f0   : > { %v2083_v17 = vadd.f32 %v2051_v55, %v1955_v58  ;;  %v2084_v9 = vadd.f32 %v2052_v48, %v1956_v18  ;;  %v1522_v37 = vmul.f32 %v4445_v45, %v1881_v63  ;;  %v1310_v28 = vadd.f32 %v1278_v39, %v1181_v30 }
 0x1f1   : > { %v1553_v4 = vadd.f32 %v1521_v61, %v1425_v6  ;;  %v1649_v41 = vmul.f32 %v4449_v44, %v2009_v60  ;;  %v1650_v0 = vmul.f32 %v2025_v57, %v3922_v21  ;;  %v3076_v36 = vunpack.c.l.bf16 %v3149_v7 }
 0x1f2   : > { %v2115_v43 = vadd.f32 %v2083_v17, %v1711_v59  ;;  %v2116_v11 = vadd.f32 %v2084_v9, %v1712_v26  ;;  %v1554_v50 = vadd.f32 %v1522_v37, %v1426_v33  ;;  %v1311_v8 = vadd.f32 %v1279_v46, %v1182_v42  ;;  %v3150_v37 = vld [vmem:[#allocation2 + $0x70] sm:$0xff]  }
 0x1f3   : > { %v1681_v49 = vadd.f32 %v1649_v41, %v1553_v4  ;;  %v3077_v15 = vunpack.c.h.bf16 %v3149_v7  ;;  %v1054_v27 = vmul.f32 %v4396_v52, %v3072_v5  ;;  %v1055_v22 = vmul.f32 %v4396_v52, %v3073_v29 }
 0x1f4   : > { %v2154_v14 = vadd.f32 %v4526_v53, %v2115_v43  ;;  %v2155_v19 = vadd.f32 %v4526_v53, %v2116_v11  ;;  %v1682_v34 = vadd.f32 %v1650_v0, %v1554_v50  ;;  %v1829_v3 = vmul.f32 %v4459_v16, %v3076_v36 }
 0x1f5   : > { %v1713_v62 = vadd.f32 %v1681_v49, %v1310_v28  ;;  %v1850_v56 = vrot.slane %v3076_v36, 7  ;;  %v1866_v59 = vrot.slane %v3077_v15, 7  ;;  %v1830_v24 = vmul.f32 %v4459_v16, %v3077_v15 }
 0x1f6   : > { %v2186_v47 = vmax.f32 %v2154_v14, 0.0  ;;  %v2187_v23 = vmax.f32 %v2155_v19, 0.0  ;;  %v1978_v1 = vrot.slane %v3076_v36, 1  ;;  %v1994_v26 = vrot.slane %v3077_v15, 1 }
 0x1f7   : > { %v1882_v5 = vsel %vm1094_vm2, %v1850_v56, %v1866_v59  ;;  %v1898_v38 = vsel %vm1094_vm2, %v1866_v59, %v1850_v56  ;;  %v1151_v55 = vmul.f32 %v1897_v40, %v3885_v51  ;;  %v1152_v18 = vmul.f32 %v4379_v32, %v1881_v63 }
 0x1f8   : > { %v2208_v29 = vpack.c.bf16 %v2187_v23, %v2186_v47  ;;  %v1925_v30 = vmul.f32 %v1898_v38, %v3928_v25  ;;  %v1926_v58 = vmul.f32 %v4415_v54, %v1882_v5  ;;  %v2010_v48 = vsel %vm1223_vm3, %v1978_v1, %v1994_v26 }
 0x1f9   : > { %v4573_v42 = vsel %vm1223_vm3, %v1994_v26, %v1978_v1  ;;  %v1183_v39 = vadd.f32 %v1151_v55, %v1054_v27  ;;  %v1280_v46 = vmul.f32 %v4428_v12, %v2009_v60  ;;  %v2053_v61 = vmul.f32 %v4431_v13, %v2010_v48 }
 0x1fa   : > { %3286 = vmatprep.mubr.bf16.mxu1 %v2208_v29  ;;  %v1957_v6 = vadd.f32 %v1925_v30, %v1829_v3  ;;  %v1958_v40 = vadd.f32 %v1926_v58, %v1830_v24  ;;  %v2054_v7 = vmul.f32 %v4573_v42, %v3939_v31  ;;  %v1714_v17 = vadd.f32 %v1682_v34, %v1311_v8 }
 0x1fb   : > { %v1184_v63 = vadd.f32 %v1152_v18, %v1055_v22  ;;  %v1281_v9 = vmul.f32 %v2025_v57, %v3904_v2  ;;  %v1312_v33 = vadd.f32 %v1280_v46, %v1183_v39  ;;  %v1427_v41 = vmul.f32 %v4439_v10, %v3076_v36 }
 0x1fc   : > { %v2085_v28 = vadd.f32 %v2053_v61, %v1957_v6  ;;  %v2086_v4 = vadd.f32 %v2054_v7, %v1958_v40  ;;  %v1523_v60 = vmul.f32 %v1898_v38, %v3919_v20  ;;  %v1428_v43 = vmul.f32 %v4439_v10, %v3077_v15 }
 0x1fd   : > { %v1313_v0 = vadd.f32 %v1281_v9, %v1184_v63  ;;  %v1524_v11 = vmul.f32 %v4445_v45, %v1882_v5  ;;  %v1651_v50 = vmul.f32 %v4449_v44, %v2010_v48  ;;  %v3080_v14 = vunpack.c.l.bf16 %v3150_v37 }
 0x1fe   : > { %v2117_v49 = vadd.f32 %v2085_v28, %v1713_v62  ;;  %v2118_v8 = vadd.f32 %v2086_v4, %v1714_v17  ;;  %v1555_v27 = vadd.f32 %v1523_v60, %v1427_v41  ;;  %v1652_v19 = vmul.f32 %v4573_v42, %v3922_v21 }
 0x1ff   : > { %v1556_v57 = vadd.f32 %v1524_v11, %v1428_v43  ;;  %v3081_v34 = vunpack.c.h.bf16 %v3150_v37  ;;  %v1056_v22 = vmul.f32 %v4396_v52, %v3076_v36  ;;  %v1057_v47 = vmul.f32 %v4396_v52, %v3077_v15 }
 0x200   : > { %v2156_v3 = vadd.f32 %v4526_v53, %v2117_v49  ;;  %v2157_v56 = vadd.f32 %v4526_v53, %v2118_v8  ;;  %v1683_v59 = vadd.f32 %v1651_v50, %v1555_v27  ;;  %v1831_v62 = vmul.f32 %v4459_v16, %v3080_v14 }
 0x201   : > { %v1684_v23 = vadd.f32 %v1652_v19, %v1556_v57  ;;  %v1851_v24 = vrot.slane %v3080_v14, 7  ;;  %v1867_v1 = vrot.slane %v3081_v34, 7  ;;  %v1832_v29 = vmul.f32 %v4459_v16, %v3081_v34 }
 0x202   : > { %v2188_v26 = vmax.f32 %v2156_v3, 0.0  ;;  %v2189_v55 = vmax.f32 %v2157_v56, 0.0  ;;  %v1979_v30 = vrot.slane %v3080_v14, 1  ;;  %v1715_v58 = vadd.f32 %v1683_v59, %v1312_v33 }
 0x203   : > { %v1883_v36 = vsel %vm1094_vm2, %v1851_v24, %v1867_v1  ;;  %v1899_v18 = vsel %vm1094_vm2, %v1867_v1, %v1851_v24  ;;  %v1995_v39 = vrot.slane %v3081_v34, 1  ;;  %v1153_v40 = vmul.f32 %v1898_v38, %v3885_v51 }
 0x204   : > { %v2209_v46 = vpack.c.bf16 %v2189_v55, %v2188_v26  ;;  %v1927_v15 = vmul.f32 %v1899_v18, %v3928_v25  ;;  %v1928_v6 = vmul.f32 %v4415_v54, %v1883_v36  ;;  %v1716_v61 = vadd.f32 %v1684_v23, %v1313_v0 }
 0x205   : > { %v4602_v7 = vsel %vm1223_vm3, %v1979_v30, %v1995_v39  ;;  %v4606_v17 = vsel %vm1223_vm3, %v1995_v39, %v1979_v30  ;;  %v1154_v63 = vmul.f32 %v4379_v32, %v1882_v5  ;;  %v1185_v28 = vadd.f32 %v1153_v40, %v1056_v22  ;;  %v3151_v5 = vld [vmem:[#allocation2 + $0x78] sm:$0xff]  }
 0x206   : > { %3287 = vmatmul.mubr.bf16.gmra.mxu1 %v2209_v46  ;;  %v1959_v9 = vadd.f32 %v1927_v15, %v1831_v62  ;;  %v1960_v33 = vadd.f32 %v1928_v6, %v1832_v29  ;;  %v2055_v37 = vmul.f32 %v4431_v13, %v4602_v7  ;;  %v2056_v38 = vmul.f32 %v4606_v17, %v3939_v31 }
 0x207   : > { %v1186_v4 = vadd.f32 %v1154_v63, %v1057_v47  ;;  %v1282_v41 = vmul.f32 %v4428_v12, %v2010_v48  ;;  %v1429_v43 = vmul.f32 %v4439_v10, %v3080_v14  ;;  %v1525_v11 = vmul.f32 %v1899_v18, %v3919_v20 }
 0x208   : > { %v2087_v60 = vadd.f32 %v2055_v37, %v1959_v9  ;;  %v2088_v0 = vadd.f32 %v2056_v38, %v1960_v33  ;;  %v1283_v50 = vmul.f32 %v4573_v42, %v3904_v2  ;;  %v1430_v8 = vmul.f32 %v4439_v10, %v3081_v34 }
 0x209   : > { %v1314_v49 = vadd.f32 %v1282_v41, %v1185_v28  ;;  %v1526_v27 = vmul.f32 %v4445_v45, %v1883_v36  ;;  %v1557_v22 = vadd.f32 %v1525_v11, %v1429_v43  ;;  %v1653_v48 = vmul.f32 %v4449_v44, %v4602_v7 }
 0x20a   : > { %v2119_v57 = vadd.f32 %v2087_v60, %v1715_v58  ;;  %v2120_v19 = vadd.f32 %v2088_v0, %v1716_v61  ;;  %v1654_v56 = vmul.f32 %v4606_v17, %v3922_v21  ;;  %v3084_v59 = vunpack.c.l.bf16 %v3151_v5 }
 0x20b   : > { %v1558_v3 = vadd.f32 %v1526_v27, %v1430_v8  ;;  %v4624_v47 = vunpack.c.h.bf16 %v3151_v5  ;;  %v1315_v62 = vadd.f32 %v1283_v50, %v1186_v4  ;;  %v1058_v24 = vmul.f32 %v4396_v52, %v3080_v14  ;;  %v3152_v27 = vld [vmem:[#allocation2 + $0x80] sm:$0xff]  }
 0x20c   : > { %v2158_v42 = vadd.f32 %v4526_v53, %v2119_v57  ;;  %v2159_v23 = vadd.f32 %v4526_v53, %v2120_v19  ;;  %v1685_v1 = vadd.f32 %v1653_v48, %v1557_v22  ;;  %v1852_v55 = vrot.slane %v3084_v59, 7 }
 0x20d   : > { %v1686_v26 = vadd.f32 %v1654_v56, %v1558_v3  ;;  %v1059_v29 = vmul.f32 %v4396_v52, %v3081_v34  ;;  %v1833_v39 = vmul.f32 %v4459_v16, %v3084_v59  ;;  %v1868_v46 = vrot.slane %v4624_v47, 7 }
 0x20e   : > { %v2190_v30 = vmax.f32 %v2158_v42, 0.0  ;;  %v2191_v58 = vmax.f32 %v2159_v23, 0.0  ;;  %v1834_v15 = vmul.f32 %v4459_v16, %v4624_v47  ;;  %v1980_v6 = vrot.slane %v3084_v59, 1 }
 0x20f   : > { %v1996_v40 = vrot.slane %v4624_v47, 1  ;;  %v1155_v61 = vmul.f32 %v1899_v18, %v3885_v51  ;;  %v1884_v63 = vsel %vm1094_vm2, %v1852_v55, %v1868_v46  ;;  %v1900_v34 = vsel %vm1094_vm2, %v1868_v46, %v1852_v55 }
 0x210   : > { %v2210_v14 = vpack.c.bf16 %v2191_v58, %v2190_v30  ;;  %v1156_v9 = vmul.f32 %v4379_v32, %v1883_v36  ;;  %v1929_v33 = vmul.f32 %v1900_v34, %v3928_v25  ;;  %v1930_v37 = vmul.f32 %v4415_v54, %v1884_v63 }
 0x211   : > { %v4645_v38 = vsel %vm1223_vm3, %v1980_v6, %v1996_v40  ;;  %v4649_v18 = vsel %vm1223_vm3, %v1996_v40, %v1980_v6  ;;  %v1717_v28 = vadd.f32 %v1685_v1, %v1314_v49  ;;  %v1718_v4 = vadd.f32 %v1686_v26, %v1315_v62 }
 0x212   : > { %3290 = vmatprep.mubr.bf16.mxu1 %v2210_v14  ;;  %v2057_v41 = vmul.f32 %v4431_v13, %v4645_v38  ;;  %v2058_v36 = vmul.f32 %v4649_v18, %v3939_v31  ;;  %v1961_v60 = vadd.f32 %v1929_v33, %v1833_v39  ;;  %v1962_v0 = vadd.f32 %v1930_v37, %v1834_v15 }
 0x213   : > { %v1187_v43 = vadd.f32 %v1155_v61, %v1058_v24  ;;  %v1188_v11 = vadd.f32 %v1156_v9, %v1059_v29  ;;  %v1431_v5 = vmul.f32 %v4439_v10, %v3084_v59  ;;  %v1432_v50 = vmul.f32 %v4439_v10, %v4624_v47 }
 0x214   : > { %v1527_v8 = vmul.f32 %v1900_v34, %v3919_v20  ;;  %v1528_v49 = vmul.f32 %v4445_v45, %v1884_v63  ;;  %v2089_v57 = vadd.f32 %v2057_v41, %v1961_v60  ;;  %v2090_v19 = vadd.f32 %v2058_v36, %v1962_v0 }
 0x215   : > { %v1284_v22 = vmul.f32 %v4428_v12, %v4602_v7  ;;  %v1285_v48 = vmul.f32 %v4606_v17, %v3904_v2  ;;  %v1655_v42 = vmul.f32 %v4449_v44, %v4645_v38  ;;  %v1656_v23 = vmul.f32 %v4649_v18, %v3922_v21 }
 0x216   : > { %v1559_v3 = vadd.f32 %v1527_v8, %v1431_v5  ;;  %v1560_v56 = vadd.f32 %v1528_v49, %v1432_v50  ;;  %v2121_v62 = vadd.f32 %v2089_v57, %v1717_v28  ;;  %v2122_v24 = vadd.f32 %v2090_v19, %v1718_v4  ;;  %v3153_v57 = vld [vmem:[#allocation2 + $0x88] sm:$0xff]  }
 0x217   : > { %v3088_v1 = vunpack.c.l.bf16 %v3152_v27  ;;  %v3089_v26 = vunpack.c.h.bf16 %v3152_v27  ;;  %v1316_v55 = vadd.f32 %v1284_v22, %v1187_v43  ;;  %v1317_v29 = vadd.f32 %v1285_v48, %v1188_v11 }
 0x218   : > { %v1687_v30 = vadd.f32 %v1655_v42, %v1559_v3  ;;  %v2160_v7 = vadd.f32 %v4526_v53, %v2121_v62  ;;  %v2161_v58 = vadd.f32 %v4526_v53, %v2122_v24  ;;  %v1688_v17 = vadd.f32 %v1656_v23, %v1560_v56 }
 0x219   : > { %v1060_v39 = vmul.f32 %v4396_v52, %v3084_v59  ;;  %v1835_v46 = vmul.f32 %v4459_v16, %v3088_v1  ;;  %v1836_v15 = vmul.f32 %v4459_v16, %v3089_v26  ;;  %v1853_v6 = vrot.slane %v3088_v1, 7 }
 0x21a   : > { %v1869_v40 = vrot.slane %v3089_v26, 7  ;;  %v2192_v61 = vmax.f32 %v2160_v7, 0.0  ;;  %v2193_v14 = vmax.f32 %v2161_v58, 0.0  ;;  %v1981_v9 = vrot.slane %v3088_v1, 1 }
 0x21b   : > { %v1997_v33 = vrot.slane %v3089_v26, 1  ;;  %v1157_v4 = vmul.f32 %v1900_v34, %v3885_v51  ;;  %v1158_v59 = vmul.f32 %v4379_v32, %v1884_v63  ;;  %v1719_v43 = vadd.f32 %v1687_v30, %v1316_v55 }
 0x21c   : > { %v1885_v37 = vsel %vm1094_vm2, %v1853_v6, %v1869_v40  ;;  %v1901_v28 = vsel %vm1094_vm2, %v1869_v40, %v1853_v6  ;;  %v2211_v41 = vpack.c.bf16 %v2193_v14, %v2192_v61  ;;  %v1720_v11 = vadd.f32 %v1688_v17, %v1317_v29 }
 0x21d   : > { %v1931_v36 = vmul.f32 %v1901_v28, %v3928_v25  ;;  %v1932_v60 = vmul.f32 %v4415_v54, %v1885_v37  ;;  %v2013_v0 = vsel %vm1223_vm3, %v1981_v9, %v1997_v33  ;;  %v2029_v5 = vsel %vm1223_vm3, %v1997_v33, %v1981_v9 }
 0x21e   : > { %v1061_v50 = vmul.f32 %v4396_v52, %v4624_v47  ;;  %3291 = vmatmul.mubr.bf16.gmra.mxu1 %v2211_v41  ;;  %v2059_v32 = vmul.f32 %v4431_v13, %v2013_v0  ;;  %v2060_v63 = vmul.f32 %v2029_v5, %v3939_v31  ;;  %v1189_v8 = vadd.f32 %v1157_v4, %v1060_v39 }
 0x21f   : > { %v1963_v51 = vadd.f32 %v1931_v36, %v1835_v46  ;;  %v1964_v34 = vadd.f32 %v1932_v60, %v1836_v15  ;;  %v1433_v49 = vmul.f32 %v4439_v10, %v3088_v1  ;;  %v1529_v27 = vmul.f32 %v1901_v28, %v3919_v20 }
 0x220   : > { %v1190_v48 = vadd.f32 %v1158_v59, %v1061_v50  ;;  %v1530_v3 = vmul.f32 %v4445_v45, %v1885_v37  ;;  %v1286_v52 = vmul.f32 %v4428_v12, %v4645_v38  ;;  %v1434_v47 = vmul.f32 %v4439_v10, %v3089_v26 }
 0x221   : > { %v2091_v19 = vadd.f32 %v2059_v32, %v1963_v51  ;;  %v2092_v22 = vadd.f32 %v2060_v63, %v1964_v34  ;;  %v1561_v56 = vadd.f32 %v1529_v27, %v1433_v49  ;;  %v1287_v62 = vmul.f32 %v4649_v18, %v3904_v2  ;;  %v3442_v51 = vld [vmem:[%s3838_s15] sm:$0xff]  }
 0x222   : > { %v3092_v24 = vunpack.c.l.bf16 %v3153_v57  ;;  %v1318_v1 = vadd.f32 %v1286_v52, %v1189_v8  ;;  %v1562_v20 = vadd.f32 %v1530_v3, %v1434_v47  ;;  %v1657_v55 = vmul.f32 %v4449_v44, %v2013_v0 }
 0x223   : > { %v2123_v42 = vadd.f32 %v2091_v19, %v1719_v43  ;;  %v2124_v23 = vadd.f32 %v2092_v22, %v1720_v11  ;;  %v3093_v29 = vunpack.c.h.bf16 %v3153_v57  ;;  %v1319_v7 = vadd.f32 %v1287_v62, %v1190_v48 }
 0x224   : > { %v1658_v12 = vmul.f32 %v2029_v5, %v3922_v21  ;;  %v1689_v10 = vadd.f32 %v1657_v55, %v1561_v56  ;;  %v1837_v38 = vmul.f32 %v4459_v16, %v3092_v24  ;;  %v1854_v26 = vrot.slane %v3092_v24, 7  ;;  %v4720_v5 = vld [vmem:[%s4861_s6] ss:$0 sm:$0xff]  ;;  %v3443_v56 = vld [vmem:[%s3838_s15 + $0x18] sm:$0xff]  }
 0x225   : > { %v2162_v30 = vadd.f32 %v4526_v53, %v2123_v42  ;;  %v2163_v45 = vadd.f32 %v4526_v53, %v2124_v23  ;;  %v1870_v58 = vrot.slane %v3093_v29, 7  ;;  %v1838_v18 = vmul.f32 %v4459_v16, %v3093_v29 }
 0x226   : > { %v1982_v39 = vrot.slane %v3092_v24, 1  ;;  %v1690_v46 = vadd.f32 %v1658_v12, %v1562_v20  ;;  %v1998_v6 = vrot.slane %v3093_v29, 1  ;;  %v1721_v14 = vadd.f32 %v1689_v10, %v1318_v1  ;;  %v3444_v24 = vld [vmem:[%s3838_s15 + $0x10] sm:$0xff]  }
 0x227   : > { %v2194_v17 = vmax.f32 %v2162_v30, 0.0  ;;  %v2195_v2 = vmax.f32 %v2163_v45, 0.0  ;;  %v1886_v44 = vsel %vm1094_vm2, %v1854_v26, %v1870_v58  ;;  %v1902_v15 = vsel %vm1094_vm2, %v1870_v58, %v1854_v26 }
 0x228   : > { %v1933_v21 = vmul.f32 %v1902_v15, %v3928_v25  ;;  %v1934_v61 = vmul.f32 %v4415_v54, %v1886_v44  ;;  %v1722_v9 = vadd.f32 %v1690_v46, %v1319_v7  ;;  %v2014_v33 = vsel %vm1223_vm3, %v1982_v39, %v1998_v6  ;;  %v3446_v44 = vld [vmem:[%s3838_s15 + $0x20] sm:$0xff]  }
 0x229   : > { %v2212_v40 = vpack.c.bf16 %v2195_v2, %v2194_v17  ;;  %v2030_v16 = vsel %vm1223_vm3, %v1998_v6, %v1982_v39  ;;  %v2061_v4 = vmul.f32 %v4431_v13, %v2014_v33  ;;  %v2478_v34 = vunpack.c.l.bf16 %v3442_v51  ;;  %v3445_v2 = vld [vmem:[%s3838_s15 + $0x28] sm:$0xff]  }
 0x22a   : > { %v1965_v37 = vadd.f32 %v1933_v21, %v1837_v38  ;;  %v1966_v28 = vadd.f32 %v1934_v61, %v1838_v18  ;;  %v2062_v59 = vmul.f32 %v2030_v16, %v3939_v31  ;;  %v3441_v31 = vld [vmem:[%s3838_s15 + $0x8] sm:$0xff]   ;;  %v2479_v57 = vunpack.c.h.bf16 %v3442_v51 }
 0x22b   : > { %3294 = vmatprep.mubr.bf16.mxu1 %v2212_v40  ;;  %v2480_v13 = vunpack.c.l.bf16 %v3441_v31  ;;  %v2481_v49 = vunpack.c.h.bf16 %v3441_v31  ;;  %v2484_v42 = vunpack.c.l.bf16 %v3443_v56  ;;  %v2482_v1 = vunpack.c.l.bf16 %v3444_v24 }
 0x22c   : > { %v2093_v25 = vadd.f32 %v2061_v4, %v1965_v37  ;;  %v2094_v54 = vadd.f32 %v2062_v59, %v1966_v28  ;;  %v2485_v30 = vunpack.c.h.bf16 %v3443_v56  ;;  %v2483_v10 = vunpack.c.h.bf16 %v3444_v24 }
 0x22d   : > { %v2488_v18 = vunpack.c.l.bf16 %v3445_v2  ;;  %v2486_v15 = vunpack.c.l.bf16 %v3446_v44  ;;  %v2489_v61 = vunpack.c.h.bf16 %v3445_v2  ;;  %v2487_v16 = vunpack.c.h.bf16 %v3446_v44 }
 0x22e   : > { %v2125_v41 = vadd.f32 %v2093_v25, %v1721_v14  ;;  %v2126_v36 = vadd.f32 %v2094_v54, %v1722_v9  ;;  %v3447_v25 = vld [vmem:[%s3838_s15 + $0x38] sm:$0xff]  }
 0x22f   : > { %v2492_v54 = vunpack.c.l.bf16 %v3447_v25  ;;  %v2493_v31 = vunpack.c.h.bf16 %v3447_v25 }
 0x230   : > { %v2164_v60 = vadd.f32 %v4526_v53, %v2125_v41  ;;  %v2165_v0 = vadd.f32 %v4526_v53, %v2126_v36 }
 0x232   : > { %v2196_v35 = vmax.f32 %v2164_v60, 0.0  ;;  %v2197_v43 = vmax.f32 %v2165_v0, 0.0  ;;  %v3448_v60 = vld [vmem:[%s3838_s15 + $0x30] sm:$0xff]  }
 0x233   : > { %v2490_v0 = vunpack.c.l.bf16 %v3448_v60 }
 0x234   : > { %v2213_v11 = vpack.c.bf16 %v2197_v43, %v2196_v35 }
 0x236   : > { %3295 = vmatmul.mubr.bf16.gmra.mxu1 %v2213_v11 }
 0x243   : > { %v3268_v50 = vpop.f32.mrf.mxu1 }
 0x244   : > { %v2448_v32 = vadd.f32 %v3268_v50, %v4720_v5 }
 0x245   : > { %v2312_v63 = vpop.f32.mrf.mxu1 }
 0x246   : > { %v2512_v8 = vadd.f32 %v2480_v13, %v2448_v32  ;;  %v2446_v53 = vadd.f32 %v4720_v5, %v2312_v63 }
 0x247   : > { %v3269_v27 = vpop.f32.mrf.mxu1 }
 0x248   : > { %2544 = vst [vmem:[%s4727_s16 + $0x10] sm:$0xff] %v2512_v8  ;;  %v2510_v19 = vadd.f32 %v2478_v34, %v2446_v53  ;;  %v2449_v22 = vadd.f32 %v3269_v27, %v4720_v5  ;;  %v2491_v34 = vunpack.c.h.bf16 %v3448_v60 }
 0x249   : > { %v2315_v48 = vpop.f32.mrf.mxu1 }
 0x24a   : > { %2542 = vst [vmem:[%s4727_s16] sm:$0xff] %v2510_v19  ;;  %v2513_v3 = vadd.f32 %v2481_v49, %v2449_v22  ;;  %v2447_v52 = vadd.f32 %v4720_v5, %v2315_v48  ;;  %v3449_v49 = vld [vmem:[%s3838_s15 + $0x48] sm:$0xff]   ;;  %v3450_v22 = vld [vmem:[%s3838_s15 + $0x40] sm:$0xff]  }
 0x24b   : > { %v2496_v27 = vunpack.c.l.bf16 %v3449_v49  ;;  %v2494_v48 = vunpack.c.l.bf16 %v3450_v22  ;;  %v2497_v56 = vunpack.c.h.bf16 %v3449_v49  ;;  %v2495_v24 = vunpack.c.h.bf16 %v3450_v22 }
 0x24c   : > { %2545 = vst [vmem:[%s4727_s16 + $0x18] sm:$0xff] %v2513_v3  ;;  %v2511_v47 = vadd.f32 %v2479_v57, %v2447_v52 }
 0x24e   : > { %2543 = vst [vmem:[%s4727_s16 + $0x8] sm:$0xff] %v2511_v47 }
 0x260   : > { %v3272_v23 = vpop.f32.mrf.mxu1 }
 0x261   : > { %v2452_v62 = vadd.f32 %v3272_v23, %v4720_v5 }
 0x262   : > { %v2328_v20 = vpop.f32.mrf.mxu1 }
 0x263   : > { %v2516_v55 = vadd.f32 %v2484_v42, %v2452_v62  ;;  %v2450_v29 = vadd.f32 %v4720_v5, %v2328_v20 }
 0x264   : > { %v3273_v45 = vpop.f32.mrf.mxu1 }
 0x265   : > { %2548 = vst [vmem:[%s4727_s16 + $0x30] sm:$0xff] %v2516_v55  ;;  %v2514_v7 = vadd.f32 %v2482_v1, %v2450_v29  ;;  %v2453_v12 = vadd.f32 %v3273_v45, %v4720_v5 }
 0x266   : > { %v2331_v38 = vpop.f32.mrf.mxu1 }
 0x267   : > { %2546 = vst [vmem:[%s4727_s16 + $0x20] sm:$0xff] %v2514_v7  ;;  %v2517_v26 = vadd.f32 %v2485_v30, %v2453_v12  ;;  %v2451_v58 = vadd.f32 %v4720_v5, %v2331_v38  ;;  %v3451_v30 = vld [vmem:[%s3838_s15 + $0x58] sm:$0xff]  }
 0x268   : > { %v2500_v45 = vunpack.c.l.bf16 %v3451_v30  ;;  %v2501_v2 = vunpack.c.h.bf16 %v3451_v30 }
 0x269   : > { %2549 = vst [vmem:[%s4727_s16 + $0x38] sm:$0xff] %v2517_v26  ;;  %v2515_v17 = vadd.f32 %v2483_v10, %v2451_v58  ;;  %v3452_v10 = vld [vmem:[%s3838_s15 + $0x50] sm:$0xff]  }
 0x26a   : > { %v2498_v38 = vunpack.c.l.bf16 %v3452_v10  ;;  %v2499_v44 = vunpack.c.h.bf16 %v3452_v10 }
 0x26b   : > { %2547 = vst [vmem:[%s4727_s16 + $0x28] sm:$0xff] %v2515_v17 }
 0x27c   : > { %v3276_v39 = vpop.f32.mrf.mxu1 }
 0x27d   : > { %v2456_v46 = vadd.f32 %v3276_v39, %v4720_v5 }
 0x27e   : > { %v2344_v6 = vpop.f32.mrf.mxu1 }
 0x27f   : > { %v2520_v40 = vadd.f32 %v2488_v18, %v2456_v46  ;;  %v2454_v21 = vadd.f32 %v4720_v5, %v2344_v6 }
 0x280   : > { %v3277_v14 = vpop.f32.mrf.mxu1 }
 0x281   : > { %2552 = vst [vmem:[%s4727_s16 + $0x50] sm:$0xff] %v2520_v40  ;;  %v2518_v9 = vadd.f32 %v2486_v15, %v2454_v21  ;;  %v2457_v33 = vadd.f32 %v3277_v14, %v4720_v5 }
 0x282   : > { %v2347_v37 = vpop.f32.mrf.mxu1 }
 0x283   : > { %2550 = vst [vmem:[%s4727_s16 + $0x40] sm:$0xff] %v2518_v9  ;;  %v2521_v28 = vadd.f32 %v2489_v61, %v2457_v33  ;;  %v2455_v4 = vadd.f32 %v4720_v5, %v2347_v37  ;;  %v3453_v61 = vld [vmem:[%s3838_s15 + $0x68] sm:$0xff]  }
 0x284   : > { %v2504_v14 = vunpack.c.l.bf16 %v3453_v61  ;;  %v2505_v25 = vunpack.c.h.bf16 %v3453_v61 }
 0x285   : > { %2553 = vst [vmem:[%s4727_s16 + $0x58] sm:$0xff] %v2521_v28  ;;  %v2519_v59 = vadd.f32 %v2487_v16, %v2455_v4  ;;  %v3454_v16 = vld [vmem:[%s3838_s15 + $0x60] sm:$0xff]  }
 0x286   : > { %v2502_v37 = vunpack.c.l.bf16 %v3454_v16  ;;  %v2503_v60 = vunpack.c.h.bf16 %v3454_v16 }
 0x287   : > { %2551 = vst [vmem:[%s4727_s16 + $0x48] sm:$0xff] %v2519_v59 }
 0x295   : > { %v3280_v41 = vpop.f32.mrf.mxu1 }
 0x296   : > { %v2460_v36 = vadd.f32 %v3280_v41, %v4720_v5 }
 0x297   : > { %v2360_v35 = vpop.f32.mrf.mxu1 }
 0x298   : > { %v2524_v43 = vadd.f32 %v2492_v54, %v2460_v36  ;;  %v2458_v11 = vadd.f32 %v4720_v5, %v2360_v35 }
 0x299   : > { %v3281_v13 = vpop.f32.mrf.mxu1 }
 0x29a   : > { %2556 = vst [vmem:[%s4727_s16 + $0x70] sm:$0xff] %v2524_v43  ;;  %v2522_v50 = vadd.f32 %v2490_v0, %v2458_v11  ;;  %v2461_v51 = vadd.f32 %v3281_v13, %v4720_v5 }
 0x29b   : > { %v2363_v32 = vpop.f32.mrf.mxu1 }
 0x29c   : > { %2554 = vst [vmem:[%s4727_s16 + $0x60] sm:$0xff] %v2522_v50  ;;  %v2525_v63 = vadd.f32 %v2493_v31, %v2461_v51  ;;  %v2459_v8 = vadd.f32 %v4720_v5, %v2363_v32  ;;  %v3455_v31 = vld [vmem:[%s3838_s15 + $0x78] sm:$0xff]  }
 0x29d   : > { %v2508_v13 = vunpack.c.l.bf16 %v3455_v31  ;;  %v2509_v49 = vunpack.c.h.bf16 %v3455_v31 }
 0x29e   : > { %2557 = vst [vmem:[%s4727_s16 + $0x78] sm:$0xff] %v2525_v63  ;;  %v2523_v53 = vadd.f32 %v2491_v34, %v2459_v8  ;;  %v3456_v34 = vld [vmem:[%s3838_s15 + $0x70] sm:$0xff]  }
 0x29f   : > { %v2506_v32 = vunpack.c.l.bf16 %v3456_v34  ;;  %v2507_v22 = vunpack.c.h.bf16 %v3456_v34 }
 0x2a0   : > { %2555 = vst [vmem:[%s4727_s16 + $0x68] sm:$0xff] %v2523_v53 }
 0x2ae   : > { %v3284_v57 = vpop.f32.mrf.mxu1 }
 0x2af   : > { %v2464_v19 = vadd.f32 %v3284_v57, %v4720_v5 }
 0x2b0   : > { %v2376_v3 = vpop.f32.mrf.mxu1 }
 0x2b1   : > { %v2528_v52 = vadd.f32 %v2496_v27, %v2464_v19  ;;  %v2462_v47 = vadd.f32 %v4720_v5, %v2376_v3 }
 0x2b2   : > { %v3285_v42 = vpop.f32.mrf.mxu1 }
 0x2b3   : > { %2560 = vst [vmem:[%s4727_s16 + $0x90] sm:$0xff] %v2528_v52  ;;  %v2526_v23 = vadd.f32 %v2494_v48, %v2462_v47  ;;  %v2465_v62 = vadd.f32 %v3285_v42, %v4720_v5 }
 0x2b4   : > { %v2379_v1 = vpop.f32.mrf.mxu1 }
 0x2b5   : > { %2558 = vst [vmem:[%s4727_s16 + $0x80] sm:$0xff] %v2526_v23  ;;  %v2529_v20 = vadd.f32 %v2497_v56, %v2465_v62  ;;  %v2463_v55 = vadd.f32 %v4720_v5, %v2379_v1 }
 0x2b7   : > { %2561 = vst [vmem:[%s4727_s16 + $0x98] sm:$0xff] %v2529_v20  ;;  %v2527_v29 = vadd.f32 %v2495_v24, %v2463_v55 }
 0x2b9   : > { %2559 = vst [vmem:[%s4727_s16 + $0x88] sm:$0xff] %v2527_v29 }
 0x2c6   : > { %v3288_v7 = vpop.f32.mrf.mxu1 }
 0x2c7   : > { %v2468_v12 = vadd.f32 %v3288_v7, %v4720_v5 }
 0x2c8   : > { %v2392_v26 = vpop.f32.mrf.mxu1 }
 0x2c9   : > { %v2532_v58 = vadd.f32 %v2500_v45, %v2468_v12  ;;  %v2466_v17 = vadd.f32 %v4720_v5, %v2392_v26 }
 0x2ca   : > { %v3289_v18 = vpop.f32.mrf.mxu1 }
 0x2cb   : > { %2564 = vst [vmem:[%s4727_s16 + $0xb0] sm:$0xff] %v2532_v58  ;;  %v2530_v39 = vadd.f32 %v2498_v38, %v2466_v17  ;;  %v2469_v46 = vadd.f32 %v3289_v18, %v4720_v5 }
 0x2cc   : > { %v2395_v15 = vpop.f32.mrf.mxu1 }
 0x2cd   : > { %2562 = vst [vmem:[%s4727_s16 + $0xa0] sm:$0xff] %v2530_v39  ;;  %v2533_v6 = vadd.f32 %v2501_v2, %v2469_v46  ;;  %v2467_v40 = vadd.f32 %v4720_v5, %v2395_v15 }
 0x2cf   : > { %2565 = vst [vmem:[%s4727_s16 + $0xb8] sm:$0xff] %v2533_v6  ;;  %v2531_v21 = vadd.f32 %v2499_v44, %v2467_v40 }
 0x2d1   : > { %2563 = vst [vmem:[%s4727_s16 + $0xa8] sm:$0xff] %v2531_v21 }
 0x2de   : > { %v3292_v9 = vpop.f32.mrf.mxu1 }
 0x2df   : > { %v2472_v33 = vadd.f32 %v3292_v9, %v4720_v5 }
 0x2e0   : > { %v2408_v28 = vpop.f32.mrf.mxu1 }
 0x2e1   : > { %v2536_v4 = vadd.f32 %v2504_v14, %v2472_v33  ;;  %v2470_v59 = vadd.f32 %v4720_v5, %v2408_v28 }
 0x2e2   : > { %v3293_v54 = vpop.f32.mrf.mxu1 }
 0x2e3   : > { %2568 = vst [vmem:[%s4727_s16 + $0xd0] sm:$0xff] %v2536_v4  ;;  %v2534_v41 = vadd.f32 %v2502_v37, %v2470_v59  ;;  %v2473_v36 = vadd.f32 %v3293_v54, %v4720_v5 }
 0x2e4   : > { %v2411_v0 = vpop.f32.mrf.mxu1 }
 0x2e5   : > { %2566 = vst [vmem:[%s4727_s16 + $0xc0] sm:$0xff] %v2534_v41  ;;  %v2537_v35 = vadd.f32 %v2505_v25, %v2473_v36  ;;  %v2471_v43 = vadd.f32 %v4720_v5, %v2411_v0 }
 0x2e7   : > { %2569 = vst [vmem:[%s4727_s16 + $0xd8] sm:$0xff] %v2537_v35  ;;  %v2535_v11 = vadd.f32 %v2503_v60, %v2471_v43 }
 0x2e9   : > { %2567 = vst [vmem:[%s4727_s16 + $0xc8] sm:$0xff] %v2535_v11 }
 0x2f6   : > { %v3296_v50 = vpop.f32.mrf.mxu1 }
 0x2f7   : > { %v2476_v51 = vadd.f32 %v3296_v50, %v4720_v5 }
 0x2f8   : > { %v2424_v63 = vpop.f32.mrf.mxu1 }
 0x2f9   : > { %v2540_v8 = vadd.f32 %v2508_v13, %v2476_v51  ;;  %v2474_v53 = vadd.f32 %v4720_v5, %v2424_v63 }
 0x2fa   : > { %v3297_v27 = vpop.f32.mrf.mxu1 }
 0x2fb   : > { %2572 = vst [vmem:[%s4727_s16 + $0xf0] sm:$0xff] %v2540_v8  ;;  %v2538_v57 = vadd.f32 %v2506_v32, %v2474_v53  ;;  %v2477_v19 = vadd.f32 %v3297_v27, %v4720_v5 }
 0x2fc   : > { %v2427_v48 = vpop.f32.mrf.mxu1 }
 0x2fd   : > { %2570 = vst [vmem:[%s4727_s16 + $0xe0] sm:$0xff] %v2538_v57  ;;  %v2541_v3 = vadd.f32 %v2509_v49, %v2477_v19  ;;  %v2475_v52 = vadd.f32 %v4720_v5, %v2427_v48 }
 0x2ff   : > { %2573 = vst [vmem:[%s4727_s16 + $0xf8] sm:$0xff] %v2541_v3  ;;  %v2539_v47 = vadd.f32 %v2507_v22, %v2475_v52 }
 0x301   : > { %2571 = vst [vmem:[%s4727_s16 + $0xe8] sm:$0xff] %v2539_v47 }
 0x302   : > { %3576 = shalt.err (!%p3573_p9)
}
 0x303   : > { %s3577_s12 = scalar_lea.hbm %s4808_s30, 4096  ;;  %s3581_s23 = scalar_lea.hbm %s4862_s7, 8192 }
 0x304   : > { %p3578_p1 = scmp.ne.s32.totalorder %s4808_s30, %s3577_s12  ;;  %p3582_p8 = scmp.lt.s32.totalorder %s4808_s30, %s4862_s7 }
 0x305   : > { %p3583_p3 = scmp.lt.s32.totalorder %s3581_s23, %s3577_s12 }
 0x306   : > { %p3579_p4 = pnand %p3578_p1, %p4885_p12 }
 0x307   : > { %p3584_p11 = por %p3583_p3, %p3582_p8 }
 0x308   : > { %p3580_p6 = pneg %p3579_p4 }
 0x30a   : > { %p3585_p7 = pnand %p3584_p11, %p3580_p6 }
 0x30c   : > { %3588 = shalt.err (!%p3585_p7)
}
 0x30d   : > { %s3648_s29 = smov 128   ;;  %s3649_s15 = smov 8  }
 0x30e   : > { %3312 = dma.vmem_to_hbm [thread:$0]  (%p4885_p12), %s4810_s1, 4096, %s4808_s30, %s2575_s28, %s3648_s29, %s3648_s29, %s3649_s15  }
 0x30f PF: > { %s2603_s9 = sand.u32 1, %s3623_s24   ;;  %p4886_p13 = scmp.ne.s32.totalorder %s4871_s8, 0 }
 0x310   : > { %p4887_p0 = scmp.ge.s32.totalorder %s3635_s27, 2  ;;  %s2604_s11 = scalar_lea.sflag [#allocation5], %s2603_s9 }
 0x312   : > { %p3329_p5 = pnand %p4887_p0, %p4886_p13 }
 0x314   : > { %p3330_p10 = pneg %p3329_p5 }
 0x316   : > { %3618 = dma.done.wait (%p3330_p10), %s2604_s11, 4096  }
 0x317   : > { %3620 = vsyncadd (%p3330_p10), %s2604_s11, 4294963200  ;;  %p22_p2 = scmp.ge.s32.totalorder %s3765_s13, 4   ;;  %s4888_s24 = smov %s3627_s25 }
 0x318   : > { %s4889_s25 = smov %s3631_s26  ;;  %s4890_s26 = smov %s3786_s20 }
 0x319   : > { %s4891_s27 = smov %s3765_s13  ;;  %24 = sbr.rel (!%p22_p2) target bundleno = 9 (0x9), region = 108 }
 0x31e   :  { %2609 = vsyncpa [#allocation4], 1 }
 0x31f   :  { %2611 = vsyncpa [#allocation4 + $0x1], 1 }
 0x320   :  { %2612 = vsyncpa [#allocation7], 1 }
 0x321   :  { %2613 = vsyncpa [#allocation10], 1 }
 0x322   :  { %2614 = vsyncpa [#allocation5], 1 }
 0x323   :  { %2616 = vsyncpa [#allocation5 + $0x1], 1 }

</bundles_post_ra>
